<compile_context>
chip_gen: v7x
topology: tpu7x:2x2x1
jax: 0.10.0
libtpu: 0.0.40
codegen_flags: <defaults>
</compile_context>

<pallas_src>
import jax
import jax.numpy as jnp
from jax.experimental import pallas as pl
from jax.experimental.pallas import tpu as pltpu

HIDDEN = 768      # BERT hidden size
FC1 = 128
FC2 = 16
FC3 = 3
PAD = 128         # lane-dense padding for the 16 / 3 wide layers
VOCAB = 100
MAX_SEQ = 16
NUM_TYPES = 2

# packed head-weight row offsets
W1_OFF = 0
W2_OFF = HIDDEN
W3_OFF = HIDDEN + FC1
HEAD_ROWS = HIDDEN + FC1 + PAD   # 1024


def _leaky_relu(x):
    # F.leaky_relu(x, 0.1) in f32
    return jnp.where(x > 0, x, 0.1 * x)


def _head_kernel(cls_ref, wp_ref, wh_ref, bias_ref, out_ref):
    """BERT pooler + 3-layer MLP head; bf16 weights, f32 accumulation."""
    x = cls_ref[...]                                     # (TB, 768) f32

    # pooler: tanh(x @ Wp + bp)
    pooled = jnp.tanh(
        jnp.dot(x.astype(jnp.bfloat16), wp_ref[...],
                preferred_element_type=jnp.float32)
        + bias_ref[0:1, :])

    # fcbert1 (768 -> 128) + leaky_relu(0.1); dropout(0.3) is identity in eval.
    w1 = wh_ref[W1_OFF:W1_OFF + HIDDEN, :]               # (768, 128) bf16
    h1 = _leaky_relu(
        jnp.dot(pooled.astype(jnp.bfloat16), w1,
                preferred_element_type=jnp.float32)
        + bias_ref[1:2, :FC1])

    # fcbert2 (128 -> 16, zero-padded to 128 lanes) + leaky_relu(0.1)
    # padded lanes stay exactly 0: 0 @ W = 0, bias pad = 0, leaky_relu(0) = 0.
    w2 = wh_ref[W2_OFF:W2_OFF + FC1, :]                  # (128, 128) bf16
    h2 = _leaky_relu(
        jnp.dot(h1.astype(jnp.bfloat16), w2,
                preferred_element_type=jnp.float32)
        + bias_ref[2:3, :PAD])

    # fcbert3 (16 -> 3, zero-padded to 128x128)
    w3 = wh_ref[W3_OFF:W3_OFF + PAD, :]                  # (128, 128) bf16
    out_ref[...] = (
        jnp.dot(h2.astype(jnp.bfloat16), w3,
                preferred_element_type=jnp.float32)
        + bias_ref[3:4, :PAD])


def _head_pallas(cls_hidden, params, tile_b=256):
    """Runs the head kernel.  Small batches: single un-gridded call with
    everything VMEM-resident.  Large batches: batch-tiled, weights resident."""
    B = cls_hidden.shape[0]
    wp, wh, bias = params["pooler_w"], params["head_w"], params["bias"]

    if B <= tile_b:
        # Pad batch to a multiple of 8 so stores are unmasked full-sublane vst.
        b_pad = max(8, -(-B // 8) * 8)
        x = (jnp.pad(cls_hidden, ((0, b_pad - B), (0, 0)))
             if b_pad != B else cls_hidden)
        vmem = pl.BlockSpec(memory_space=pltpu.MemorySpace.VMEM)
        out = pl.pallas_call(
            _head_kernel,
            out_shape=jax.ShapeDtypeStruct((b_pad, PAD), jnp.float32),
            in_specs=[vmem, vmem, vmem, vmem],
            out_specs=vmem,
        )(x, wp, wh, bias)
    else:
        # Batch-tiled path: weights/biases map to block (0, 0) every step so
        # they are fetched once and stay VMEM-resident; batch axis is
        # "parallel" so v7x can shard it across both TensorCores.
        b_pad = -(-B // tile_b) * tile_b
        x = (jnp.pad(cls_hidden, ((0, b_pad - B), (0, 0)))
             if b_pad != B else cls_hidden)
        out = pl.pallas_call(
            _head_kernel,
            out_shape=jax.ShapeDtypeStruct((b_pad, PAD), jnp.float32),
            grid=(b_pad // tile_b,),
            in_specs=[
                pl.BlockSpec((tile_b, HIDDEN), lambda i: (i, 0)),
                pl.BlockSpec((HIDDEN, HIDDEN), lambda i: (0, 0)),
                pl.BlockSpec((HEAD_ROWS, PAD), lambda i: (0, 0)),
                pl.BlockSpec((4, HIDDEN), lambda i: (0, 0)),
            ],
            out_specs=pl.BlockSpec((tile_b, PAD), lambda i: (i, 0)),
            compiler_params=pltpu.CompilerParams(
                dimension_semantics=("parallel",)),
        )(x, wp, wh, bias)
    return out[:B]


def init_params(key):
    ks = jax.random.split(key, 8)
    s = 0.02
    p = {
        # embedding tables (BERT embedding layer stand-in), f32
        "word_emb": s * jax.random.normal(ks[0], (VOCAB, HIDDEN), jnp.float32),
        "pos_emb":  s * jax.random.normal(ks[1], (MAX_SEQ, HIDDEN), jnp.float32),
        "type_emb": s * jax.random.normal(ks[2], (NUM_TYPES, HIDDEN), jnp.float32),
        # pooler weight: the single largest HBM transfer -> bf16
        "pooler_w": (s * jax.random.normal(ks[3], (HIDDEN, HIDDEN),
                                           jnp.float32)).astype(jnp.bfloat16),
    }

    # fcbert1/2/3 packed into one (1024, 128) bf16 array, zero-padded lanes.
    w1 = s * jax.random.normal(ks[4], (HIDDEN, FC1), jnp.float32)
    w2 = s * jax.random.normal(ks[5], (FC1, FC2), jnp.float32)
    w3 = s * jax.random.normal(ks[6], (FC2, FC3), jnp.float32)
    head_w = jnp.zeros((HEAD_ROWS, PAD), jnp.float32)
    head_w = head_w.at[W1_OFF:W1_OFF + HIDDEN, :FC1].set(w1)
    head_w = head_w.at[W2_OFF:W2_OFF + FC1, :FC2].set(w2)
    head_w = head_w.at[W3_OFF:W3_OFF + FC2, :FC3].set(w3)
    p["head_w"] = head_w.astype(jnp.bfloat16)

    # All four biases packed into one (4, 768) f32 array:
    # row 0: pooler bias (768), rows 1-3: fc1/fc2/fc3 biases in first lanes.
    bias = jnp.zeros((4, HIDDEN), jnp.float32)
    bias = bias.at[1, :FC1].set(0.01)
    bias = bias.at[2, :FC2].set(0.01)
    bias = bias.at[3, :FC3].set(0.01)
    p["bias"] = bias
    return p


def text_model_forward(params, input_ids, attention_mask, token_type_ids):
    """Mirrors TextModel.forward.

    TODO(synk): the 12-layer BERT transformer encoder has no clean single
    Pallas-kernel equivalent here; the stand-in feeds the CLS-position
    embedding sum directly into the pooler (attention_mask is consumed only by
    the stubbed encoder).
    """
    del attention_mask
    # Gather embeddings only for position 0 (the only position the pooler
    # uses) instead of materializing the full (B, S, 768) tensor.
    cls_hidden = (params["word_emb"][input_ids[:, 0]]
                  + params["pos_emb"][0][None, :]
                  + params["type_emb"][token_type_ids[:, 0]])   # (B, 768)
    logits_padded = _head_pallas(cls_hidden, params)            # (B, 128)
    return logits_padded[:, :FC3]                               # (B, 3)


if __name__ == "__main__":
    key = jax.random.PRNGKey(0)
    pkey, ikey = jax.random.split(key)
    params = init_params(pkey)

    B, S = 2, 8
    input_ids = jax.random.randint(ikey, (B, S), 0, VOCAB, dtype=jnp.int32)
    attention_mask = jnp.ones((B, S), jnp.int32)
    token_type_ids = jnp.zeros((B, S), jnp.int32)

    out = text_model_forward(params, input_ids, attention_mask, token_type_ids)
    out = jax.block_until_ready(out)
    assert out.shape == (B, FC3), out.shape
    print("KERNEL_OK")
</pallas_src>

<mosaic_0001>
module attributes {stable_mosaic.version = 11 : i64} {
  func.func @_head_kernel(%arg0: memref<8x768xf32, #tpu.memory_space<vmem>>, %arg1: memref<768x768xbf16, #tpu.memory_space<vmem>>, %arg2: memref<1024x128xbf16, #tpu.memory_space<vmem>>, %arg3: memref<4x768xf32, #tpu.memory_space<vmem>>, %arg4: memref<8x128xf32, #tpu.memory_space<vmem>>) attributes {dimension_semantics = [], scalar_prefetch = 0 : i64, scratch_operands = 0 : i64, tpu.core_type = #tpu.core_type<tc>} {
    %c0 = arith.constant 0 : index
    %c0_0 = arith.constant 0 : index
    %0 = vector.load %arg0[%c0, %c0_0] : memref<8x768xf32, #tpu.memory_space<vmem>>, vector<8x768xf32>
    %1 = arith.truncf %0 : vector<8x768xf32> to vector<8x768xbf16>
    %c0_1 = arith.constant 0 : index
    %c0_2 = arith.constant 0 : index
    %2 = vector.load %arg1[%c0_1, %c0_2] : memref<768x768xbf16, #tpu.memory_space<vmem>>, vector<768x768xbf16>
    %cst = arith.constant dense<0.000000e+00> : vector<8x768xf32>
    %3 = tpu.matmul %1, %2, %cst {dimension_numbers = #tpu.dot_dimension_numbers<[1], [0], [0], [1], [0, 0, 1, 1], [], []>} : vector<8x768xbf16>, vector<768x768xbf16>, vector<8x768xf32> -> vector<8x768xf32>
    %c0_3 = arith.constant 0 : index
    %c0_4 = arith.constant 0 : index
    %4 = vector.load %arg3[%c0_3, %c0_4] : memref<4x768xf32, #tpu.memory_space<vmem>>, vector<1x768xf32>
    %5 = vector.broadcast %4 : vector<1x768xf32> to vector<8x768xf32>
    %6 = arith.addf %3, %5 : vector<8x768xf32>
    %7 = math.tanh %6 : vector<8x768xf32>
    %c0_5 = arith.constant 0 : index
    %c0_6 = arith.constant 0 : index
    %8 = vector.load %arg2[%c0_5, %c0_6] : memref<1024x128xbf16, #tpu.memory_space<vmem>>, vector<768x128xbf16>
    %9 = arith.truncf %7 : vector<8x768xf32> to vector<8x768xbf16>
    %cst_7 = arith.constant dense<0.000000e+00> : vector<8x128xf32>
    %10 = tpu.matmul %9, %8, %cst_7 {dimension_numbers = #tpu.dot_dimension_numbers<[1], [0], [0], [1], [0, 0, 1, 1], [], []>} : vector<8x768xbf16>, vector<768x128xbf16>, vector<8x128xf32> -> vector<8x128xf32>
    %c1 = arith.constant 1 : index
    %c0_8 = arith.constant 0 : index
    %11 = vector.load %arg3[%c1, %c0_8] : memref<4x768xf32, #tpu.memory_space<vmem>>, vector<1x128xf32>
    %12 = vector.broadcast %11 : vector<1x128xf32> to vector<8x128xf32>
    %13 = arith.addf %10, %12 : vector<8x128xf32>
    %cst_9 = arith.constant 0.000000e+00 : f32
    %14 = vector.broadcast %cst_9 : f32 to vector<8x128xf32>
    %15 = arith.cmpf ogt, %13, %14 : vector<8x128xf32>
    %cst_10 = arith.constant 1.000000e-01 : f32
    %16 = vector.broadcast %cst_10 : f32 to vector<8x128xf32>
    %17 = arith.mulf %16, %13 : vector<8x128xf32>
    %18 = arith.select %15, %13, %17 : vector<8x128xi1>, vector<8x128xf32>
    %c768 = arith.constant 768 : index
    %c0_11 = arith.constant 0 : index
    %19 = vector.load %arg2[%c768, %c0_11] : memref<1024x128xbf16, #tpu.memory_space<vmem>>, vector<128x128xbf16>
    %20 = arith.truncf %18 : vector<8x128xf32> to vector<8x128xbf16>
    %cst_12 = arith.constant dense<0.000000e+00> : vector<8x128xf32>
    %21 = tpu.matmul %20, %19, %cst_12 {dimension_numbers = #tpu.dot_dimension_numbers<[1], [0], [0], [1], [0, 0, 1, 1], [], []>} : vector<8x128xbf16>, vector<128x128xbf16>, vector<8x128xf32> -> vector<8x128xf32>
    %c2 = arith.constant 2 : index
    %c0_13 = arith.constant 0 : index
    %22 = vector.load %arg3[%c2, %c0_13] : memref<4x768xf32, #tpu.memory_space<vmem>>, vector<1x128xf32>
    %23 = vector.broadcast %22 : vector<1x128xf32> to vector<8x128xf32>
    %24 = arith.addf %21, %23 : vector<8x128xf32>
    %cst_14 = arith.constant 0.000000e+00 : f32
    %25 = vector.broadcast %cst_14 : f32 to vector<8x128xf32>
    %26 = arith.cmpf ogt, %24, %25 : vector<8x128xf32>
    %cst_15 = arith.constant 1.000000e-01 : f32
    %27 = vector.broadcast %cst_15 : f32 to vector<8x128xf32>
    %28 = arith.mulf %27, %24 : vector<8x128xf32>
    %29 = arith.select %26, %24, %28 : vector<8x128xi1>, vector<8x128xf32>
    %c896 = arith.constant 896 : index
    %c0_16 = arith.constant 0 : index
    %30 = vector.load %arg2[%c896, %c0_16] : memref<1024x128xbf16, #tpu.memory_space<vmem>>, vector<128x128xbf16>
    %31 = arith.truncf %29 : vector<8x128xf32> to vector<8x128xbf16>
    %cst_17 = arith.constant dense<0.000000e+00> : vector<8x128xf32>
    %32 = tpu.matmul %31, %30, %cst_17 {dimension_numbers = #tpu.dot_dimension_numbers<[1], [0], [0], [1], [0, 0, 1, 1], [], []>} : vector<8x128xbf16>, vector<128x128xbf16>, vector<8x128xf32> -> vector<8x128xf32>
    %c3 = arith.constant 3 : index
    %c0_18 = arith.constant 0 : index
    %33 = vector.load %arg3[%c3, %c0_18] : memref<4x768xf32, #tpu.memory_space<vmem>>, vector<1x128xf32>
    %34 = vector.broadcast %33 : vector<1x128xf32> to vector<8x128xf32>
    %35 = arith.addf %32, %34 : vector<8x128xf32>
    %c0_19 = arith.constant 0 : index
    %c0_20 = arith.constant 0 : index
    %36 = vector.load %arg4[%c0_19, %c0_20] : memref<8x128xf32, #tpu.memory_space<vmem>>, vector<8x128xf32>
    tpu.vector_store %arg4[%c0_19, %c0_20], %35 {strides = array<i32>} : memref<8x128xf32, #tpu.memory_space<vmem>>, vector<8x128xf32>,
    return
  }
}

</mosaic_0001>

<bundles_post_ra>
// kernel: tpu_custom_call.1
= control target key start
LH: loop header
LB: loop body
LE: loop exit
PB: predicated region body
PF: predicated region fallthrough
CT: control target
= control target key end

     0   :  { %9 = vsyncpa [#allocation3], 0  ;;  %s4284_s0 = inlined_call_operand.hbm [shape: f32[8,768], index: 0, kind: input, shape index: {}]   ;;  %s4285_s1 = inlined_call_operand.hbm [shape: bf16[768,768], index: 1, kind: input, shape index: {}]   ;;  %s4286_s2 = inlined_call_operand.hbm [shape: bf16[1024,128], index: 2, kind: input, shape index: {}]   ;;  %s4287_s3 = inlined_call_operand.hbm [shape: f32[4,768], index: 3, kind: input, shape index: {}]   ;;  %s4288_s4 = inlined_call_operand.hbm [shape: f32[8,128], index: 4, kind: output, shape index: {}]  }
   0x1   :  { %10 = vsyncpa [#allocation6], 0 }
   0x2   :  { %11 = vsyncpa [#allocation9], 0 }
   0x3   :  { %12 = vsyncpa [#allocation4], 0  ;;  %s4122_s15 = smov [#allocation5]   ;;  %s4004_s19 = scalar_lea.hbm %s4285_s1, 36864 }
   0x4   :  { %s28_s16 = sshll.u32 %s4122_s15, 4  ;;  %p4005_p0 = scmp.ne.s32.totalorder %s4285_s1, %s4004_s19  ;;  %s29_s16 = int_to_ptr.vmem [resolvable:$true] %s28_s16 }
   0x5   :  { %p4008_p1 = scmp.lt.u32.totalorder %s4004_s19, %s4285_s1 }
   0x7   :  { %p4010_p2 = pnand %p4008_p1, %p4005_p0 }
   0x9   :  { %4013 = shalt.err (!%p4010_p2)
}
   0xa   :  { %s4014_s24 = scalar_lea.vmem %s29_s16, 36864  ;;  %p4019_p4 = scmp.lt.s32.totalorder %s29_s16, %s29_s16 }
   0xb   :  { %p4015_p3 = scmp.ne.s32.totalorder %s29_s16, %s4014_s24  ;;  %p4020_p5 = scmp.lt.s32.totalorder %s4014_s24, %s4014_s24 }
   0xd   :  { %p4021_p6 = por %p4020_p5, %p4019_p4 }
   0xf   :  { %p4022_p7 = pnand %p4021_p6, %p4015_p3 }
  0x11   :  { %4025 = shalt.err (!%p4022_p7)
}
  0x12   :  { %s4123_s25 = smov 384   ;;  %s4124_s26 = smov 24  }
  0x13   :  { %34 = dma.hbm_to_vmem [thread:$0]  %s4285_s1, 36864, %s29_s16, [#allocation6], %s4123_s25, %s4123_s25, %s4124_s26  }
  0x14   :  { %s4125_s29 = smov [#allocation2]   ;;  %s4126_s5 = smov [#allocation7]  }
  0x15   :  { %s19_s30 = sshll.u32 %s4125_s29, 4  ;;  %s40_s6 = sshll.u32 %s4126_s5, 4  ;;  %s20_s30 = int_to_ptr.vmem [resolvable:$true] %s19_s30  ;;  %s41_s6 = int_to_ptr.vmem [resolvable:$true] %s40_s6 }
  0x16   :  { %s4026_s9 = scalar_lea.hbm %s4284_s0, 768 }
  0x17   :  { %p4027_p8 = scmp.ne.s32.totalorder %s4284_s0, %s4026_s9  ;;  %p4030_p9 = scmp.lt.u32.totalorder %s4026_s9, %s4284_s0 }
  0x19   :  { %p4032_p10 = pnand %p4030_p9, %p4027_p8 }
  0x1b   :  { %4035 = shalt.err (!%p4032_p10)
}
  0x1c   :  { %s4036_s1 = scalar_lea.vmem %s20_s30, 768  ;;  %p4041_p12 = scmp.lt.s32.totalorder %s20_s30, %s20_s30 }
  0x1d   :  { %p4037_p11 = scmp.ne.s32.totalorder %s20_s30, %s4036_s1  ;;  %p4042_p13 = scmp.lt.s32.totalorder %s4036_s1, %s4036_s1 }
  0x1f   :  { %p4043_p0 = por %p4042_p13, %p4041_p12 }
  0x21   :  { %p4044_p1 = pnand %p4043_p0, %p4037_p11 }
  0x23   :  { %4047 = shalt.err (!%p4044_p1)
}
  0x24   :  { %22 = dma.hbm_to_vmem [thread:$0]  %s4284_s0, 768, %s20_s30, [#allocation3]  }
  0x25   :  { %s4048_s18 = scalar_lea.hbm %s4286_s2, 8192 }
  0x26   :  { %p4049_p2 = scmp.ne.s32.totalorder %s4286_s2, %s4048_s18  ;;  %p4052_p3 = scmp.lt.u32.totalorder %s4048_s18, %s4286_s2 }
  0x28   :  { %p4054_p4 = pnand %p4052_p3, %p4049_p2 }
  0x2a   :  { %4057 = shalt.err (!%p4054_p4)
}
  0x2b   :  { %s4058_s23 = scalar_lea.vmem %s41_s6, 8192  ;;  %p4063_p6 = scmp.lt.s32.totalorder %s41_s6, %s41_s6 }
  0x2c   :  { %p4059_p5 = scmp.ne.s32.totalorder %s41_s6, %s4058_s23  ;;  %p4064_p7 = scmp.lt.s32.totalorder %s4058_s23, %s4058_s23 }
  0x2e   :  { %p4065_p8 = por %p4064_p7, %p4063_p6 }
  0x30   :  { %p4066_p9 = pnand %p4065_p8, %p4059_p5 }
  0x32   :  { %4069 = shalt.err (!%p4066_p9)
}
  0x33   :  { %s4127_s0 = smov 64   ;;  %s4128_s24 = smov 4  }
  0x34   :  { %46 = dma.hbm_to_vmem [thread:$0]  %s4286_s2, 8192, %s41_s6, [#allocation6], %s4127_s0, %s4127_s0, %s4128_s24  }
  0x35   :  { %s4129_s27 = smov [#allocation8]   ;;  %s4070_s5 = scalar_lea.hbm %s4287_s3, 384 }
  0x36   :  { %s53_s28 = sshll.u32 %s4129_s27, 4  ;;  %p4071_p10 = scmp.ne.s32.totalorder %s4287_s3, %s4070_s5  ;;  %s54_s28 = int_to_ptr.vmem [resolvable:$true] %s53_s28 }
  0x37   :  { %p4074_p11 = scmp.lt.u32.totalorder %s4070_s5, %s4287_s3 }
  0x39   :  { %p4076_p12 = pnand %p4074_p11, %p4071_p10 }
  0x3b   :  { %4079 = shalt.err (!%p4076_p12)
}
  0x3c   :  { %s4080_s11 = scalar_lea.vmem %s54_s28, 384  ;;  %p4085_p0 = scmp.lt.s32.totalorder %s54_s28, %s54_s28 }
  0x3d   :  { %p4081_p13 = scmp.ne.s32.totalorder %s54_s28, %s4080_s11  ;;  %p4086_p1 = scmp.lt.s32.totalorder %s4080_s11, %s4080_s11 }
  0x3f   :  { %p4087_p2 = por %p4086_p1, %p4085_p0 }
  0x41   :  { %p4088_p3 = pnand %p4087_p2, %p4081_p13 }
  0x43   :  { %4091 = shalt.err (!%p4088_p3)
}
  0x44   :  { %56 = dma.hbm_to_vmem [thread:$0]  %s4287_s3, 384, %s54_s28, [#allocation9]  }
  0x45   :  { %4114 = dma.done.wait [#allocation3], 768  }
  0x46   :  { %4115 = vsyncadd [#allocation3], 4294966528 }
  0x47   :  { %4116 = dma.done.wait [#allocation6], 45056  }
  0x48   :  { %4117 = vsyncadd [#allocation6], 4294922240 }
  0x49   :  { %4118 = dma.done.wait [#allocation9], 384  }
  0x4a   :  { %4119 = vsyncadd [#allocation9], 4294966912  ;;  %v3496_v0 = vld [vmem:[#allocation5 + $0x4] ss:$24 sps:$4 sm:$0xff]   ;;  %v3498_v1 = vld [vmem:[#allocation5] ss:$24 sps:$4 sm:$0xff]  }
  0x4b   :  { %1842 = vmatprep.subr.bf16.mxu0 %v3496_v0  ;;  %v3499_v2 = vld [vmem:[#allocation5 + $0x34] ss:$24 sps:$4 sm:$0xff]   ;;  %v3501_v3 = vld [vmem:[#allocation5 + $0x30] ss:$24 sps:$4 sm:$0xff]   ;;  %v3502_v4 = vld [vmem:[#allocation5 + $0x64] ss:$24 sps:$4 sm:$0xff]  }
  0x4c   :  { %1843 = vmatpush1.bf16.msra.mxu0 %v3498_v1  ;;  %v3504_v5 = vld [vmem:[#allocation5 + $0x60] ss:$24 sps:$4 sm:$0xff]   ;;  %v3505_v6 = vld [vmem:[#allocation5 + $0x94] ss:$24 sps:$4 sm:$0xff]   ;;  %v3507_v7 = vld [vmem:[#allocation5 + $0x90] ss:$24 sps:$4 sm:$0xff]  }
  0x4d   :  { %1844 = vmatprep.subr.bf16.mxu0 %v3499_v2  ;;  %v3520_v8 = vld [vmem:[#allocation5 + $0xc] ss:$24 sps:$4 sm:$0xff]   ;;  %v3524_v10 = vld [vmem:[#allocation5 + $0x8] ss:$24 sps:$4 sm:$0xff]   ;;  %v3526_v11 = vld [vmem:[#allocation5 + $0x3c] ss:$24 sps:$4 sm:$0xff]  }
  0x4e   :  { %v3508_v9 = vld [vmem:[#allocation5 + $0xc4] ss:$24 sps:$4 sm:$0xff]   ;;  %1965 = vmatprep.subr.bf16.mxu1 %v3520_v8  ;;  %v3510_v12 = vld [vmem:[#allocation5 + $0xc0] ss:$24 sps:$4 sm:$0xff]   ;;  %v3511_v13 = vld [vmem:[#allocation5 + $0xf4] ss:$24 sps:$4 sm:$0xff]  }
  0x4f   :  { %1966 = vmatpush1.bf16.msra.mxu1 %v3524_v10  ;;  %v3530_v14 = vld [vmem:[#allocation5 + $0x38] ss:$24 sps:$4 sm:$0xff]   ;;  %v3532_v15 = vld [vmem:[#allocation5 + $0x6c] ss:$24 sps:$4 sm:$0xff]   ;;  %v3536_v17 = vld [vmem:[#allocation5 + $0x68] ss:$24 sps:$4 sm:$0xff]  }
  0x50   :  { %1845 = vmatpush1.bf16.msra.mxu0 %v3501_v3  ;;  %1967 = vmatprep.subr.bf16.mxu1 %v3526_v11  ;;  %v3513_v16 = vld [vmem:[#allocation5 + $0xf0] ss:$24 sps:$4 sm:$0xff]   ;;  %v3538_v18 = vld [vmem:[#allocation5 + $0x9c] ss:$24 sps:$4 sm:$0xff]   ;;  %v3516_v21 = vld [vmem:[#allocation5 + $0x120] ss:$24 sps:$4 sm:$0xff]  }
  0x51   :  { %1846 = vmatprep.subr.bf16.mxu0 %v3502_v4  ;;  %v3514_v19 = vld [vmem:[#allocation5 + $0x124] ss:$24 sps:$4 sm:$0xff]   ;;  %v3542_v20 = vld [vmem:[#allocation5 + $0x98] ss:$24 sps:$4 sm:$0xff]   ;;  %v3517_v23 = vld [vmem:[#allocation5 + $0x154] ss:$24 sps:$4 sm:$0xff]  }
  0x52   :  { %v3544_v22 = vld [vmem:[#allocation5 + $0xcc] ss:$24 sps:$4 sm:$0xff]   ;;  %v3519_v24 = vld [vmem:[#allocation5 + $0x150] ss:$24 sps:$4 sm:$0xff]   ;;  %v3550_v26 = vld [vmem:[#allocation5 + $0xfc] ss:$24 sps:$4 sm:$0xff]  }
  0x53   :  { %1968 = vmatpush1.bf16.msra.mxu1 %v3530_v14  ;;  %v3548_v25 = vld [vmem:[#allocation5 + $0xc8] ss:$24 sps:$4 sm:$0xff]   ;;  %v3522_v27 = vld [vmem:[#allocation5 + $0x184] ss:$24 sps:$4 sm:$0xff]   ;;  %v3554_v28 = vld [vmem:[#allocation5 + $0xf8] ss:$24 sps:$4 sm:$0xff]  }
  0x54   :  { %1847 = vmatpush1.bf16.msra.mxu0 %v3504_v5  ;;  %1969 = vmatprep.subr.bf16.mxu1 %v3532_v15  ;;  %v3525_v29 = vld [vmem:[#allocation5 + $0x180] ss:$24 sps:$4 sm:$0xff]   ;;  %v3556_v30 = vld [vmem:[#allocation5 + $0x12c] ss:$24 sps:$4 sm:$0xff]   ;;  %v3531_v33 = vld [vmem:[#allocation5 + $0x1b0] ss:$24 sps:$4 sm:$0xff]  }
  0x55   :  { %1848 = vmatprep.subr.bf16.mxu0 %v3505_v6  ;;  %v3528_v31 = vld [vmem:[#allocation5 + $0x1b4] ss:$24 sps:$4 sm:$0xff]   ;;  %v71_v32 = vld [vmem:[#allocation2 + $0x8] sm:$0xff]  ;;  %v3560_v34 = vld [vmem:[#allocation5 + $0x128] ss:$24 sps:$4 sm:$0xff]   ;;  %vm4131_vm0 = vmmov 0  }
  0x56   :  { %v4206_v35 = vpack.c.bf16 %v71_v32, %v71_v32  ;;  %v3562_v36 = vld [vmem:[#allocation5 + $0x15c] ss:$24 sps:$4 sm:$0xff]   ;;  %v3537_v38 = vld [vmem:[#allocation5 + $0x1e0] ss:$24 sps:$4 sm:$0xff]   ;;  %v3568_v40 = vld [vmem:[#allocation5 + $0x18c] ss:$24 sps:$4 sm:$0xff]  }
  0x57   :  { %1970 = vmatpush1.bf16.msra.mxu1 %v3536_v17  ;;  %v3534_v37 = vld [vmem:[#allocation5 + $0x1e4] ss:$24 sps:$4 sm:$0xff]   ;;  %v3566_v39 = vld [vmem:[#allocation5 + $0x158] ss:$24 sps:$4 sm:$0xff]   ;;  %v3540_v41 = vld [vmem:[#allocation5 + $0x214] ss:$24 sps:$4 sm:$0xff]  }
  0x58   :  { %1849 = vmatpush1.bf16.msra.mxu0 %v3507_v7  ;;  %1971 = vmatprep.subr.bf16.mxu1 %v3538_v18  ;;  %v3543_v42 = vld [vmem:[#allocation5 + $0x210] ss:$24 sps:$4 sm:$0xff]   ;;  %v3574_v44 = vld [vmem:[#allocation5 + $0x1bc] ss:$24 sps:$4 sm:$0xff]   ;;  %v3549_v46 = vld [vmem:[#allocation5 + $0x240] ss:$24 sps:$4 sm:$0xff]  }
  0x59   :  { %1850 = vmatprep.subr.bf16.mxu0 %v3508_v9  ;;  %1874 = vmatprep.mubr.bf16.mxu0 %v4206_v35  ;;  %v3573_v43 = vld [vmem:[#allocation5 + $0x188] ss:$24 sps:$4 sm:$0xff]   ;;  %v3546_v45 = vld [vmem:[#allocation5 + $0x244] ss:$24 sps:$4 sm:$0xff]   ;;  %v3579_v47 = vld [vmem:[#allocation5 + $0x1b8] ss:$24 sps:$4 sm:$0xff]  }
  0x5a   :  { %1997 = vmatprep.mubr.bf16.mxu1 %v4206_v35  ;;  %v3580_v48 = vld [vmem:[#allocation5 + $0x1ec] ss:$24 sps:$4 sm:$0xff]   ;;  %v3555_v50 = vld [vmem:[#allocation5 + $0x270] ss:$24 sps:$4 sm:$0xff]   ;;  %v3586_v52 = vld [vmem:[#allocation5 + $0x21c] ss:$24 sps:$4 sm:$0xff]  }
  0x5b   :  { %1972 = vmatpush1.bf16.msra.mxu1 %v3542_v20  ;;  %v3552_v49 = vld [vmem:[#allocation5 + $0x274] ss:$24 sps:$4 sm:$0xff]   ;;  %v3585_v51 = vld [vmem:[#allocation5 + $0x1e8] ss:$24 sps:$4 sm:$0xff]   ;;  %v3558_v53 = vld [vmem:[#allocation5 + $0x2a4] ss:$24 sps:$4 sm:$0xff]  }
  0x5c   :  { %1851 = vmatpush1.bf16.msra.mxu0 %v3510_v12  ;;  %1973 = vmatprep.subr.bf16.mxu1 %v3544_v22  ;;  %v3561_v54 = vld [vmem:[#allocation5 + $0x2a0] ss:$24 sps:$4 sm:$0xff]   ;;  %v3592_v56 = vld [vmem:[#allocation5 + $0x24c] ss:$24 sps:$4 sm:$0xff]   ;;  %v3567_v58 = vld [vmem:[#allocation5 + $0x2d0] ss:$24 sps:$4 sm:$0xff]  }
  0x5d   :  { %1852 = vmatprep.subr.bf16.mxu0 %v3511_v13  ;;  %v3591_v55 = vld [vmem:[#allocation5 + $0x218] ss:$24 sps:$4 sm:$0xff]   ;;  %v3564_v57 = vld [vmem:[#allocation5 + $0x2d4] ss:$24 sps:$4 sm:$0xff]   ;;  %v3597_v60 = vld [vmem:[#allocation5 + $0x248] ss:$24 sps:$4 sm:$0xff]  }
  0x5e   :  { %v70_v59 = vld [vmem:[#allocation2] sm:$0xff]  ;;  %v3572_v62 = vld [vmem:[#allocation5 + $0x304] ss:$24 sps:$4 sm:$0xff]   ;;  %v3570_v63 = vld [vmem:[#allocation5 + $0x300] ss:$24 sps:$4 sm:$0xff]   ;;  %s4132_s3 = smov [#allocation10]  }
  0x5f   :  { %1974 = vmatpush1.bf16.msra.mxu1 %v3548_v25  ;;  %v3598_v61 = vld [vmem:[#allocation5 + $0x27c] ss:$24 sps:$4 sm:$0xff]   ;;  %v4210_v0 = vpack.c.bf16 %v70_v59, %v70_v59  ;;  %v3603_v1 = vld [vmem:[#allocation5 + $0x278] ss:$24 sps:$4 sm:$0xff]   ;;  %v3604_v2 = vld [vmem:[#allocation5 + $0x2ac] ss:$24 sps:$4 sm:$0xff]  }
  0x60   :  { %1853 = vmatpush1.bf16.msra.mxu0 %v3513_v16  ;;  %1975 = vmatprep.subr.bf16.mxu1 %v3550_v26  ;;  %v3578_v3 = vld [vmem:[#allocation5 + $0x334] ss:$24 sps:$4 sm:$0xff]   ;;  %v3576_v4 = vld [vmem:[#allocation5 + $0x330] ss:$24 sps:$4 sm:$0xff]   ;;  %v3584_v7 = vld [vmem:[#allocation5 + $0x364] ss:$24 sps:$4 sm:$0xff]  }
  0x61   :  { %1854 = vmatprep.subr.bf16.mxu0 %v3514_v19  ;;  %v3609_v5 = vld [vmem:[#allocation5 + $0x2a8] ss:$24 sps:$4 sm:$0xff]   ;;  %v3610_v6 = vld [vmem:[#allocation5 + $0x2dc] ss:$24 sps:$4 sm:$0xff]   ;;  %v3615_v9 = vld [vmem:[#allocation5 + $0x2d8] ss:$24 sps:$4 sm:$0xff]  }
  0x62   :  { %v3582_v8 = vld [vmem:[#allocation5 + $0x360] ss:$24 sps:$4 sm:$0xff]   ;;  %v3618_v10 = vld [vmem:[#allocation5 + $0x30c] ss:$24 sps:$4 sm:$0xff]   ;;  %v3588_v12 = vld [vmem:[#allocation5 + $0x390] ss:$24 sps:$4 sm:$0xff]  }
  0x63   :  { %1976 = vmatpush1.bf16.msra.mxu1 %v3554_v28  ;;  %v3590_v11 = vld [vmem:[#allocation5 + $0x394] ss:$24 sps:$4 sm:$0xff]   ;;  %v3616_v13 = vld [vmem:[#allocation5 + $0x308] ss:$24 sps:$4 sm:$0xff]   ;;  %v3596_v15 = vld [vmem:[#allocation5 + $0x3c4] ss:$24 sps:$4 sm:$0xff]  }
  0x64   :  { %1855 = vmatpush1.bf16.msra.mxu0 %v3516_v21  ;;  %1977 = vmatprep.subr.bf16.mxu1 %v3556_v30  ;;  %v3624_v14 = vld [vmem:[#allocation5 + $0x33c] ss:$24 sps:$4 sm:$0xff]   ;;  %v73_v16 = vld [vmem:[#allocation2 + $0x18] sm:$0xff]  ;;  %v3622_v18 = vld [vmem:[#allocation5 + $0x338] ss:$24 sps:$4 sm:$0xff]   ;;  %s2965_s12 = sshll.u32 %s4132_s3, 4  ;;  %s2966_s12 = int_to_ptr.vmem [resolvable:$true] %s2965_s12 }
  0x65   :  { %1856 = vmatprep.subr.bf16.mxu0 %v3517_v23  ;;  %v4214_v17 = vpack.c.bf16 %v73_v16, %v73_v16  ;;  %v3594_v19 = vld [vmem:[#allocation5 + $0x3c0] ss:$24 sps:$4 sm:$0xff]   ;;  %v3630_v20 = vld [vmem:[#allocation5 + $0x36c] ss:$24 sps:$4 sm:$0xff]   ;;  %v3600_v23 = vld [vmem:[#allocation5 + $0x3f0] ss:$24 sps:$4 sm:$0xff]   ;;  %p4097_p5 = scmp.lt.s32.totalorder %s2966_s12, %s2966_s12 }
  0x66   :  { %v3602_v21 = vld [vmem:[#allocation5 + $0x3f4] ss:$24 sps:$4 sm:$0xff]   ;;  %v3628_v22 = vld [vmem:[#allocation5 + $0x368] ss:$24 sps:$4 sm:$0xff]   ;;  %v3608_v25 = vld [vmem:[#allocation5 + $0x424] ss:$24 sps:$4 sm:$0xff]  }
  0x67   :  { %1978 = vmatpush1.bf16.msra.mxu1 %v3560_v34  ;;  %v3634_v26 = vld [vmem:[#allocation5 + $0x398] ss:$24 sps:$4 sm:$0xff]   ;;  %v3642_v28 = vld [vmem:[#allocation5 + $0x3cc] ss:$24 sps:$4 sm:$0xff]   ;;  %v3640_v30 = vld [vmem:[#allocation5 + $0x3c8] ss:$24 sps:$4 sm:$0xff]  }
  0x68   :  { %1857 = vmatpush1.bf16.msra.mxu0 %v3519_v24  ;;  %1979 = vmatprep.subr.bf16.mxu1 %v3562_v36  ;;  %v3636_v24 = vld [vmem:[#allocation5 + $0x39c] ss:$24 sps:$4 sm:$0xff]   ;;  %v3646_v34 = vld [vmem:[#allocation5 + $0x3f8] ss:$24 sps:$4 sm:$0xff]   ;;  %s4092_s13 = scalar_lea.vmem %s2966_s12, 128 }
  0x69   :  { %1858 = vmatprep.subr.bf16.mxu0 %v3522_v27  ;;  %v3606_v27 = vld [vmem:[#allocation5 + $0x420] ss:$24 sps:$4 sm:$0xff]   ;;  %v3648_v32 = vld [vmem:[#allocation5 + $0x3fc] ss:$24 sps:$4 sm:$0xff]   ;;  %p4093_p4 = scmp.ne.s32.totalorder %s2966_s12, %s4092_s13  ;;  %p4098_p6 = scmp.lt.s32.totalorder %s4092_s13, %s4092_s13 }
  0x6a   :  { %v3619_v36 = vld [vmem:[#allocation5 + $0x480] ss:$24 sps:$4 sm:$0xff]  }
  0x6b   :  { %1980 = vmatpush1.bf16.msra.mxu1 %v3566_v39  ;;  %v3652_v39 = vld [vmem:[#allocation5 + $0x428] ss:$24 sps:$4 sm:$0xff]   ;;  %p4099_p7 = por %p4098_p6, %p4097_p5 }
  0x6c   :  { %1859 = vmatpush1.bf16.msra.mxu0 %v3525_v29  ;;  %1981 = vmatprep.subr.bf16.mxu1 %v3568_v40  ;;  %v3614_v29 = vld [vmem:[#allocation5 + $0x454] ss:$24 sps:$4 sm:$0xff]   ;;  %v3625_v40 = vld [vmem:[#allocation5 + $0x4b0] ss:$24 sps:$4 sm:$0xff]   ;;  %v3655_v59 = vld [vmem:[#allocation5 + $0x5a0] ss:$24 sps:$4 sm:$0xff]  }
  0x6d   :  { %1860 = vmatprep.subr.bf16.mxu0 %v3528_v31  ;;  %v3612_v31 = vld [vmem:[#allocation5 + $0x450] ss:$24 sps:$4 sm:$0xff]   ;;  %v3679_v16 = vld [vmem:[#allocation5 + $0x660] ss:$24 sps:$4 sm:$0xff]   ;;  %p4100_p8 = pnand %p4099_p7, %p4093_p4 }
  0x6f   :  { %1982 = vmatpush1.bf16.msra.mxu1 %v3573_v43  ;;  %v3658_v43 = vld [vmem:[#allocation5 + $0x458] ss:$24 sps:$4 sm:$0xff]  }
  0x70   :  { %1861 = vmatpush1.bf16.msra.mxu0 %v3531_v33  ;;  %1983 = vmatprep.subr.bf16.mxu1 %v3574_v44  ;;  %v3621_v33 = vld [vmem:[#allocation5 + $0x484] ss:$24 sps:$4 sm:$0xff]   ;;  %v3631_v44 = vld [vmem:[#allocation5 + $0x4e0] ss:$24 sps:$4 sm:$0xff]  }
  0x71   :  { %1862 = vmatprep.subr.bf16.mxu0 %v3534_v37  ;;  %v3654_v37 = vld [vmem:[#allocation5 + $0x42c] ss:$24 sps:$4 sm:$0xff]  }
  0x73   :  { %1984 = vmatpush1.bf16.msra.mxu1 %v3579_v47  ;;  %v3664_v47 = vld [vmem:[#allocation5 + $0x488] ss:$24 sps:$4 sm:$0xff]  }
  0x74   :  { %1863 = vmatpush1.bf16.msra.mxu0 %v3537_v38  ;;  %1985 = vmatprep.subr.bf16.mxu1 %v3580_v48  ;;  %v3627_v38 = vld [vmem:[#allocation5 + $0x4b4] ss:$24 sps:$4 sm:$0xff]   ;;  %v3637_v48 = vld [vmem:[#allocation5 + $0x510] ss:$24 sps:$4 sm:$0xff]  }
  0x75   :  { %1864 = vmatprep.subr.bf16.mxu0 %v3540_v41  ;;  %v3660_v41 = vld [vmem:[#allocation5 + $0x45c] ss:$24 sps:$4 sm:$0xff]  }
  0x77   :  { %1986 = vmatpush1.bf16.msra.mxu1 %v3585_v51  ;;  %v3670_v51 = vld [vmem:[#allocation5 + $0x4b8] ss:$24 sps:$4 sm:$0xff]  }
  0x78   :  { %1865 = vmatpush1.bf16.msra.mxu0 %v3543_v42  ;;  %1987 = vmatprep.subr.bf16.mxu1 %v3586_v52  ;;  %v3633_v42 = vld [vmem:[#allocation5 + $0x4e4] ss:$24 sps:$4 sm:$0xff]   ;;  %v3643_v52 = vld [vmem:[#allocation5 + $0x540] ss:$24 sps:$4 sm:$0xff]  }
  0x79   :  { %1866 = vmatprep.subr.bf16.mxu0 %v3546_v45  ;;  %v3666_v45 = vld [vmem:[#allocation5 + $0x48c] ss:$24 sps:$4 sm:$0xff]  }
  0x7b   :  { %1988 = vmatpush1.bf16.msra.mxu1 %v3591_v55  ;;  %v3676_v55 = vld [vmem:[#allocation5 + $0x4e8] ss:$24 sps:$4 sm:$0xff]  }
  0x7c   :  { %1867 = vmatpush1.bf16.msra.mxu0 %v3549_v46  ;;  %1989 = vmatprep.subr.bf16.mxu1 %v3592_v56  ;;  %v3639_v46 = vld [vmem:[#allocation5 + $0x514] ss:$24 sps:$4 sm:$0xff]   ;;  %v3649_v56 = vld [vmem:[#allocation5 + $0x570] ss:$24 sps:$4 sm:$0xff]  }
  0x7d   :  { %1868 = vmatprep.subr.bf16.mxu0 %v3552_v49  ;;  %v3672_v49 = vld [vmem:[#allocation5 + $0x4bc] ss:$24 sps:$4 sm:$0xff]  }
  0x7f   :  { %1990 = vmatpush1.bf16.msra.mxu1 %v3597_v60  ;;  %v3682_v60 = vld [vmem:[#allocation5 + $0x518] ss:$24 sps:$4 sm:$0xff]  }
  0x80   :  { %1869 = vmatpush1.bf16.msra.mxu0 %v3555_v50  ;;  %1991 = vmatprep.subr.bf16.mxu1 %v3598_v61  ;;  %v3645_v50 = vld [vmem:[#allocation5 + $0x544] ss:$24 sps:$4 sm:$0xff]  }
  0x81   :  { %1870 = vmatprep.subr.bf16.mxu0 %v3558_v53  ;;  %v3678_v53 = vld [vmem:[#allocation5 + $0x4ec] ss:$24 sps:$4 sm:$0xff]  }
  0x82   :  { %v3690_v61 = vld [vmem:[#allocation5 + $0x54c] ss:$24 sps:$4 sm:$0xff]  }
  0x83   :  { %1992 = vmatpush1.bf16.msra.mxu1 %v3603_v1  ;;  %v72_v1 = vld [vmem:[#allocation2 + $0x10] sm:$0xff] }
  0x84   :  { %1871 = vmatpush1.bf16.msra.mxu0 %v3561_v54  ;;  %1993 = vmatprep.subr.bf16.mxu1 %v3604_v2  ;;  %v3651_v54 = vld [vmem:[#allocation5 + $0x574] ss:$24 sps:$4 sm:$0xff]   ;;  %v3688_v2 = vld [vmem:[#allocation5 + $0x548] ss:$24 sps:$4 sm:$0xff]  }
  0x85   :  { %1872 = vmatprep.subr.bf16.mxu0 %v3564_v57  ;;  %v3684_v57 = vld [vmem:[#allocation5 + $0x51c] ss:$24 sps:$4 sm:$0xff]  }
  0x87   :  { %1994 = vmatpush1.bf16.msra.mxu1 %v3609_v5  ;;  %v3667_v5 = vld [vmem:[#allocation5 + $0x600] ss:$24 sps:$4 sm:$0xff]  }
  0x88   :  { %1873 = vmatpush1.bf16.msra.mxu0 %v3567_v58  ;;  %1995 = vmatprep.subr.bf16.mxu1 %v3610_v6  ;;  %v3657_v58 = vld [vmem:[#allocation5 + $0x5a4] ss:$24 sps:$4 sm:$0xff]  }
  0x89   :  { %1883 = vmatprep.subr.bf16.mxu0 %v3572_v62  ;;  %v3663_v62 = vld [vmem:[#allocation5 + $0x5d4] ss:$24 sps:$4 sm:$0xff]   ;;  %v75_v6 = vld [vmem:[#allocation2 + $0x28] sm:$0xff] }
  0x8b   :  { %1875 = vmatmul.mubr.bf16.vlgmr.msra.gmra.mrb[0].mxu0 %v4210_v0  ;;  %1996 = vmatpush1.bf16.msra.mxu1 %v3615_v9  ;;  %v3702_v9 = vld [vmem:[#allocation5 + $0x5ac] ss:$24 sps:$4 sm:$0xff]  }
  0x8c   :  { %1884 = vmatpush1.bf16.msra.mxu0 %v3570_v63  ;;  %2006 = vmatprep.subr.bf16.mxu1 %v3618_v10  ;;  %v3661_v63 = vld [vmem:[#allocation5 + $0x5d0] ss:$24 sps:$4 sm:$0xff]   ;;  %v3675_v10 = vld [vmem:[#allocation5 + $0x634] ss:$24 sps:$4 sm:$0xff]  }
  0x8d   :  { %1885 = vmatprep.subr.bf16.mxu0 %v3578_v3  ;;  %1915 = vmatprep.mubr.bf16.mxu0 %v4214_v17  ;;  %v3696_v3 = vld [vmem:[#allocation5 + $0x57c] ss:$24 sps:$4 sm:$0xff]  }
  0x8e   :  { %1998 = vmatmul.mubr.bf16.vlgmr.msra.gmra.mrb[0].mxu1 %v4210_v0 }
  0x8f   :  { %2007 = vmatpush1.bf16.msra.mxu1 %v3616_v13  ;;  %2038 = vmatprep.mubr.bf16.mxu1 %v4214_v17  ;;  %v3700_v13 = vld [vmem:[#allocation5 + $0x5a8] ss:$24 sps:$4 sm:$0xff]  }
  0x90   :  { %1886 = vmatpush1.bf16.msra.mxu0 %v3576_v4  ;;  %2008 = vmatprep.subr.bf16.mxu1 %v3624_v14  ;;  %v3669_v4 = vld [vmem:[#allocation5 + $0x604] ss:$24 sps:$4 sm:$0xff]  }
  0x91   :  { %1887 = vmatprep.subr.bf16.mxu0 %v3584_v7  ;;  %v4218_v7 = vpack.c.bf16 %v72_v1, %v72_v1  ;;  %v3708_v14 = vld [vmem:[#allocation5 + $0x5dc] ss:$24 sps:$4 sm:$0xff]  }
  0x92   :  { %v3753_v1 = vld [vmem:[#allocation5 + $0x8a4] ss:$24 sps:$4 sm:$0xff]  }
  0x93   :  { %2009 = vmatpush1.bf16.msra.mxu1 %v3622_v18  ;;  %v3706_v18 = vld [vmem:[#allocation5 + $0x5d8] ss:$24 sps:$4 sm:$0xff]  }
  0x94   :  { %1888 = vmatpush1.bf16.msra.mxu0 %v3582_v8  ;;  %2010 = vmatprep.subr.bf16.mxu1 %v3630_v20  ;;  %v3694_v8 = vld [vmem:[#allocation5 + $0x578] ss:$24 sps:$4 sm:$0xff]   ;;  %v3687_v20 = vld [vmem:[#allocation5 + $0x694] ss:$24 sps:$4 sm:$0xff]  }
  0x95   :  { %1889 = vmatprep.subr.bf16.mxu0 %v3590_v11  ;;  %v4220_v11 = vpack.c.bf16 %v75_v6, %v75_v6  ;;  %v3786_v6 = vld [vmem:[#allocation5 + $0x84c] ss:$24 sps:$4 sm:$0xff]  }
  0x97   :  { %2011 = vmatpush1.bf16.msra.mxu1 %v3628_v22  ;;  %v3712_v22 = vld [vmem:[#allocation5 + $0x608] ss:$24 sps:$4 sm:$0xff]  }
  0x98   :  { %1890 = vmatpush1.bf16.msra.mxu0 %v3588_v12  ;;  %2012 = vmatprep.subr.bf16.mxu1 %v3636_v24  ;;  %v3673_v12 = vld [vmem:[#allocation5 + $0x630] ss:$24 sps:$4 sm:$0xff]   ;;  %v3693_v24 = vld [vmem:[#allocation5 + $0x6c4] ss:$24 sps:$4 sm:$0xff]  }
  0x99   :  { %1891 = vmatprep.subr.bf16.mxu0 %v3596_v15  ;;  %v3681_v15 = vld [vmem:[#allocation5 + $0x664] ss:$24 sps:$4 sm:$0xff]  }
  0x9b   :  { %2013 = vmatpush1.bf16.msra.mxu1 %v3634_v26  ;;  %v3718_v26 = vld [vmem:[#allocation5 + $0x638] ss:$24 sps:$4 sm:$0xff]  }
  0x9c   :  { %1892 = vmatpush1.bf16.msra.mxu0 %v3594_v19  ;;  %2014 = vmatprep.subr.bf16.mxu1 %v3642_v28  ;;  %v3714_v19 = vld [vmem:[#allocation5 + $0x60c] ss:$24 sps:$4 sm:$0xff]  }
  0x9d   :  { %1893 = vmatprep.subr.bf16.mxu0 %v3602_v21  ;;  %v3685_v21 = vld [vmem:[#allocation5 + $0x690] ss:$24 sps:$4 sm:$0xff]   ;;  %v3699_v28 = vld [vmem:[#allocation5 + $0x6f4] ss:$24 sps:$4 sm:$0xff]  }
  0x9f   :  { %2015 = vmatpush1.bf16.msra.mxu1 %v3640_v30  ;;  %v3724_v30 = vld [vmem:[#allocation5 + $0x668] ss:$24 sps:$4 sm:$0xff]  }
  0xa0   :  { %1894 = vmatpush1.bf16.msra.mxu0 %v3600_v23  ;;  %2016 = vmatprep.subr.bf16.mxu1 %v3648_v32  ;;  %v3720_v23 = vld [vmem:[#allocation5 + $0x63c] ss:$24 sps:$4 sm:$0xff]  }
  0xa1   :  { %1895 = vmatprep.subr.bf16.mxu0 %v3608_v25  ;;  %v3691_v25 = vld [vmem:[#allocation5 + $0x6c0] ss:$24 sps:$4 sm:$0xff]   ;;  %v3705_v32 = vld [vmem:[#allocation5 + $0x724] ss:$24 sps:$4 sm:$0xff]  }
  0xa3   :  { %2017 = vmatpush1.bf16.msra.mxu1 %v3646_v34  ;;  %v3730_v34 = vld [vmem:[#allocation5 + $0x698] ss:$24 sps:$4 sm:$0xff]  }
  0xa4   :  { %1896 = vmatpush1.bf16.msra.mxu0 %v3606_v27  ;;  %2018 = vmatprep.subr.bf16.mxu1 %v3654_v37  ;;  %v3726_v27 = vld [vmem:[#allocation5 + $0x66c] ss:$24 sps:$4 sm:$0xff]  }
  0xa5   :  { %1897 = vmatprep.subr.bf16.mxu0 %v3614_v29  ;;  %v3697_v29 = vld [vmem:[#allocation5 + $0x6f0] ss:$24 sps:$4 sm:$0xff]   ;;  %v3711_v37 = vld [vmem:[#allocation5 + $0x754] ss:$24 sps:$4 sm:$0xff]  }
  0xa7   :  { %2019 = vmatpush1.bf16.msra.mxu1 %v3652_v39  ;;  %v3736_v39 = vld [vmem:[#allocation5 + $0x6c8] ss:$24 sps:$4 sm:$0xff]  }
  0xa8   :  { %1898 = vmatpush1.bf16.msra.mxu0 %v3612_v31  ;;  %2020 = vmatprep.subr.bf16.mxu1 %v3660_v41  ;;  %v3732_v31 = vld [vmem:[#allocation5 + $0x69c] ss:$24 sps:$4 sm:$0xff]  }
  0xa9   :  { %1899 = vmatprep.subr.bf16.mxu0 %v3621_v33  ;;  %v3703_v33 = vld [vmem:[#allocation5 + $0x720] ss:$24 sps:$4 sm:$0xff]   ;;  %v3717_v41 = vld [vmem:[#allocation5 + $0x784] ss:$24 sps:$4 sm:$0xff]  }
  0xab   :  { %2021 = vmatpush1.bf16.msra.mxu1 %v3658_v43  ;;  %v3742_v43 = vld [vmem:[#allocation5 + $0x6f8] ss:$24 sps:$4 sm:$0xff]  }
  0xac   :  { %1900 = vmatpush1.bf16.msra.mxu0 %v3619_v36  ;;  %2022 = vmatprep.subr.bf16.mxu1 %v3666_v45  ;;  %v3738_v36 = vld [vmem:[#allocation5 + $0x6cc] ss:$24 sps:$4 sm:$0xff]  }
  0xad   :  { %1901 = vmatprep.subr.bf16.mxu0 %v3627_v38  ;;  %v3709_v38 = vld [vmem:[#allocation5 + $0x750] ss:$24 sps:$4 sm:$0xff]   ;;  %v3723_v45 = vld [vmem:[#allocation5 + $0x7b4] ss:$24 sps:$4 sm:$0xff]  }
  0xaf   :  { %2023 = vmatpush1.bf16.msra.mxu1 %v3664_v47  ;;  %v3748_v47 = vld [vmem:[#allocation5 + $0x728] ss:$24 sps:$4 sm:$0xff]  }
  0xb0   :  { %1902 = vmatpush1.bf16.msra.mxu0 %v3625_v40  ;;  %2024 = vmatprep.subr.bf16.mxu1 %v3672_v49  ;;  %v3744_v40 = vld [vmem:[#allocation5 + $0x6fc] ss:$24 sps:$4 sm:$0xff]  }
  0xb1   :  { %1903 = vmatprep.subr.bf16.mxu0 %v3633_v42  ;;  %v3715_v42 = vld [vmem:[#allocation5 + $0x780] ss:$24 sps:$4 sm:$0xff]   ;;  %v3729_v49 = vld [vmem:[#allocation5 + $0x7e4] ss:$24 sps:$4 sm:$0xff]  }
  0xb3   :  { %2025 = vmatpush1.bf16.msra.mxu1 %v3670_v51  ;;  %v3727_v51 = vld [vmem:[#allocation5 + $0x7e0] ss:$24 sps:$4 sm:$0xff]  }
  0xb4   :  { %1904 = vmatpush1.bf16.msra.mxu0 %v3631_v44  ;;  %2026 = vmatprep.subr.bf16.mxu1 %v3678_v53  ;;  %v3750_v44 = vld [vmem:[#allocation5 + $0x72c] ss:$24 sps:$4 sm:$0xff]  }
  0xb5   :  { %1905 = vmatprep.subr.bf16.mxu0 %v3639_v46  ;;  %v3721_v46 = vld [vmem:[#allocation5 + $0x7b0] ss:$24 sps:$4 sm:$0xff]   ;;  %v3762_v53 = vld [vmem:[#allocation5 + $0x78c] ss:$24 sps:$4 sm:$0xff]  }
  0xb7   :  { %2027 = vmatpush1.bf16.msra.mxu1 %v3676_v55  ;;  %v3733_v55 = vld [vmem:[#allocation5 + $0x810] ss:$24 sps:$4 sm:$0xff]  }
  0xb8   :  { %1906 = vmatpush1.bf16.msra.mxu0 %v3637_v48  ;;  %2028 = vmatprep.subr.bf16.mxu1 %v3684_v57  ;;  %v3756_v48 = vld [vmem:[#allocation5 + $0x75c] ss:$24 sps:$4 sm:$0xff]  }
  0xb9   :  { %1907 = vmatprep.subr.bf16.mxu0 %v3645_v50  ;;  %v3754_v50 = vld [vmem:[#allocation5 + $0x758] ss:$24 sps:$4 sm:$0xff]   ;;  %v3768_v57 = vld [vmem:[#allocation5 + $0x7bc] ss:$24 sps:$4 sm:$0xff]  }
  0xbb   :  { %2029 = vmatpush1.bf16.msra.mxu1 %v3682_v60  ;;  %v3747_v60 = vld [vmem:[#allocation5 + $0x874] ss:$24 sps:$4 sm:$0xff]  }
  0xbc   :  { %1908 = vmatpush1.bf16.msra.mxu0 %v3643_v52  ;;  %2030 = vmatprep.subr.bf16.mxu1 %v3690_v61  ;;  %v3735_v52 = vld [vmem:[#allocation5 + $0x814] ss:$24 sps:$4 sm:$0xff]  }
  0xbd   :  { %1909 = vmatprep.subr.bf16.mxu0 %v3651_v54  ;;  %v3760_v54 = vld [vmem:[#allocation5 + $0x788] ss:$24 sps:$4 sm:$0xff]   ;;  %v3774_v61 = vld [vmem:[#allocation5 + $0x7ec] ss:$24 sps:$4 sm:$0xff]  }
  0xbf   :  { %2031 = vmatpush1.bf16.msra.mxu1 %v3688_v2  ;;  %v3780_v2 = vld [vmem:[#allocation5 + $0x81c] ss:$24 sps:$4 sm:$0xff]  }
  0xc0   :  { %1910 = vmatpush1.bf16.msra.mxu0 %v3649_v56  ;;  %2032 = vmatprep.subr.bf16.mxu1 %v3696_v3  ;;  %v3741_v56 = vld [vmem:[#allocation5 + $0x844] ss:$24 sps:$4 sm:$0xff]   ;;  %v3778_v3 = vld [vmem:[#allocation5 + $0x818] ss:$24 sps:$4 sm:$0xff]  }
  0xc1   :  { %1911 = vmatprep.subr.bf16.mxu0 %v3657_v58  ;;  %v3766_v58 = vld [vmem:[#allocation5 + $0x7b8] ss:$24 sps:$4 sm:$0xff]  }
  0xc3   :  { %2033 = vmatpush1.bf16.msra.mxu1 %v3694_v8  ;;  %v3784_v8 = vld [vmem:[#allocation5 + $0x848] ss:$24 sps:$4 sm:$0xff]  }
  0xc4   :  { %1912 = vmatpush1.bf16.msra.mxu0 %v3655_v59  ;;  %2034 = vmatprep.subr.bf16.mxu1 %v3702_v9  ;;  %v3739_v59 = vld [vmem:[#allocation5 + $0x840] ss:$24 sps:$4 sm:$0xff]   ;;  %v3757_v9 = vld [vmem:[#allocation5 + $0x8d0] ss:$24 sps:$4 sm:$0xff]  }
  0xc5   :  { %1913 = vmatprep.subr.bf16.mxu0 %v3663_v62  ;;  %v3772_v62 = vld [vmem:[#allocation5 + $0x7e8] ss:$24 sps:$4 sm:$0xff]  }
  0xc7   :  { %2035 = vmatpush1.bf16.msra.mxu1 %v3700_v13  ;;  %v3792_v13 = vld [vmem:[#allocation5 + $0x87c] ss:$24 sps:$4 sm:$0xff]  }
  0xc8   :  { %1914 = vmatpush1.bf16.msra.mxu0 %v3661_v63  ;;  %2036 = vmatprep.subr.bf16.mxu1 %v3708_v14  ;;  %v3745_v63 = vld [vmem:[#allocation5 + $0x870] ss:$24 sps:$4 sm:$0xff]  }
  0xc9   :  { %1924 = vmatprep.subr.bf16.mxu0 %v3669_v4  ;;  %v3751_v4 = vld [vmem:[#allocation5 + $0x8a0] ss:$24 sps:$4 sm:$0xff]  }
  0xca   :  { %v3790_v14 = vld [vmem:[#allocation5 + $0x878] ss:$24 sps:$4 sm:$0xff]  }
  0xcb   :  { %1916 = vmatmul.mubr.bf16.vlgmr.msra.gmra.mrb[0].mxu0 %v4218_v7  ;;  %2037 = vmatpush1.bf16.msra.mxu1 %v3706_v18  ;;  %v3771_v18 = vld [vmem:[#allocation5 + $0x44] ss:$24 sps:$4 sm:$0xff]  }
  0xcc   :  { %1925 = vmatpush1.bf16.msra.mxu0 %v3667_v5  ;;  %1956 = vmatprep.mubr.bf16.mxu0 %v4220_v11  ;;  %v3759_v5 = vld [vmem:[#allocation5 + $0x8d4] ss:$24 sps:$4 sm:$0xff]  }
  0xcd   :  { %1926 = vmatprep.subr.bf16.mxu0 %v3675_v10  ;;  %2047 = vmatprep.subr.bf16.mxu1 %v3714_v19  ;;  %v74_v10 = vld [vmem:[#allocation2 + $0x20] sm:$0xff]  ;;  %v3798_v19 = vld [vmem:[#allocation5 + $0x8ac] ss:$24 sps:$4 sm:$0xff]  }
  0xce   :  { %2039 = vmatmul.mubr.bf16.vlgmr.msra.gmra.mrb[0].mxu1 %v4218_v7 }
  0xcf   :  { %2048 = vmatpush1.bf16.msra.mxu1 %v3712_v22  ;;  %2079 = vmatprep.mubr.bf16.mxu1 %v4220_v11  ;;  %v3777_v22 = vld [vmem:[#allocation5 + $0x74] ss:$24 sps:$4 sm:$0xff]  }
  0xd0   :  { %1927 = vmatpush1.bf16.msra.mxu0 %v3673_v12  ;;  %2049 = vmatprep.subr.bf16.mxu1 %v3720_v23  ;;  %v3765_v12 = vld [vmem:[#allocation5 + $0x14] ss:$24 sps:$4 sm:$0xff]  }
  0xd1   :  { %1928 = vmatprep.subr.bf16.mxu0 %v3681_v15  ;;  %v3763_v15 = vld [vmem:[#allocation5 + $0x10] ss:$24 sps:$4 sm:$0xff]   ;;  %v3804_v23 = vld [vmem:[#allocation5 + $0x8dc] ss:$24 sps:$4 sm:$0xff]  }
  0xd3   :  { %2050 = vmatpush1.bf16.msra.mxu1 %v3718_v26  ;;  %v3783_v26 = vld [vmem:[#allocation5 + $0xa4] ss:$24 sps:$4 sm:$0xff]  }
  0xd4   :  { %1929 = vmatpush1.bf16.msra.mxu0 %v3679_v16  ;;  %2051 = vmatprep.subr.bf16.mxu1 %v3726_v27  ;;  %v4226_v16 = vpack.c.bf16 %v74_v10, %v74_v10  ;;  %v3781_v27 = vld [vmem:[#allocation5 + $0xa0] ss:$24 sps:$4 sm:$0xff]  }
  0xd5   :  { %1930 = vmatprep.subr.bf16.mxu0 %v3687_v20  ;;  %v3796_v20 = vld [vmem:[#allocation5 + $0x8a8] ss:$24 sps:$4 sm:$0xff]  }
  0xd6   :  { %v3937_v10 = vld [vmem:[#allocation7 + $0x20] sm:$0xff]  }
  0xd7   :  { %2052 = vmatpush1.bf16.msra.mxu1 %v3724_v30  ;;  %v3795_v30 = vld [vmem:[#allocation5 + $0x104] ss:$24 sps:$4 sm:$0xff]  }
  0xd8   :  { %1931 = vmatpush1.bf16.msra.mxu0 %v3685_v21  ;;  %2053 = vmatprep.subr.bf16.mxu1 %v3732_v31  ;;  %v3769_v21 = vld [vmem:[#allocation5 + $0x40] ss:$24 sps:$4 sm:$0xff]  }
  0xd9   :  { %1932 = vmatprep.subr.bf16.mxu0 %v3693_v24  ;;  %v3802_v24 = vld [vmem:[#allocation5 + $0x8d8] ss:$24 sps:$4 sm:$0xff]  }
  0xda   :  { %v3793_v31 = vld [vmem:[#allocation5 + $0x100] ss:$24 sps:$4 sm:$0xff]  }
  0xdb   :  { %2054 = vmatpush1.bf16.msra.mxu1 %v3730_v34  ;;  %v3805_v34 = vld [vmem:[#allocation5 + $0x160] ss:$24 sps:$4 sm:$0xff]  }
  0xdc   :  { %1933 = vmatpush1.bf16.msra.mxu0 %v3691_v25  ;;  %2055 = vmatprep.subr.bf16.mxu1 %v3738_v36  ;;  %v3775_v25 = vld [vmem:[#allocation5 + $0x70] ss:$24 sps:$4 sm:$0xff]   ;;  %v3810_v36 = vld [vmem:[#allocation5 + $0x194] ss:$24 sps:$4 sm:$0xff]  }
  0xdd   :  { %1934 = vmatprep.subr.bf16.mxu0 %v3699_v28  ;;  %v3789_v28 = vld [vmem:[#allocation5 + $0xd4] ss:$24 sps:$4 sm:$0xff]  }
  0xdf   :  { %2056 = vmatpush1.bf16.msra.mxu1 %v3736_v39  ;;  %v3811_v39 = vld [vmem:[#allocation5 + $0x1c0] ss:$24 sps:$4 sm:$0xff]  }
  0xe0   :  { %1935 = vmatpush1.bf16.msra.mxu0 %v3697_v29  ;;  %2057 = vmatprep.subr.bf16.mxu1 %v3744_v40  ;;  %v3787_v29 = vld [vmem:[#allocation5 + $0xd0] ss:$24 sps:$4 sm:$0xff]   ;;  %v3816_v40 = vld [vmem:[#allocation5 + $0x1f4] ss:$24 sps:$4 sm:$0xff]  }
  0xe1   :  { %1936 = vmatprep.subr.bf16.mxu0 %v3705_v32  ;;  %v3799_v32 = vld [vmem:[#allocation5 + $0x130] ss:$24 sps:$4 sm:$0xff]  }
  0xe3   :  { %2058 = vmatpush1.bf16.msra.mxu1 %v3742_v43  ;;  %v3817_v43 = vld [vmem:[#allocation5 + $0x220] ss:$24 sps:$4 sm:$0xff]  }
  0xe4   :  { %1937 = vmatpush1.bf16.msra.mxu0 %v3703_v33  ;;  %2059 = vmatprep.subr.bf16.mxu1 %v3750_v44  ;;  %v3807_v33 = vld [vmem:[#allocation5 + $0x164] ss:$24 sps:$4 sm:$0xff]   ;;  %v3822_v44 = vld [vmem:[#allocation5 + $0x254] ss:$24 sps:$4 sm:$0xff]  }
  0xe5   :  { %1938 = vmatprep.subr.bf16.mxu0 %v3711_v37  ;;  %v3808_v37 = vld [vmem:[#allocation5 + $0x190] ss:$24 sps:$4 sm:$0xff]  }
  0xe7   :  { %2060 = vmatpush1.bf16.msra.mxu1 %v3748_v47  ;;  %v3823_v47 = vld [vmem:[#allocation5 + $0x280] ss:$24 sps:$4 sm:$0xff]  }
  0xe8   :  { %1939 = vmatpush1.bf16.msra.mxu0 %v3709_v38  ;;  %2061 = vmatprep.subr.bf16.mxu1 %v3756_v48  ;;  %v3813_v38 = vld [vmem:[#allocation5 + $0x1c4] ss:$24 sps:$4 sm:$0xff]   ;;  %v3828_v48 = vld [vmem:[#allocation5 + $0x2b4] ss:$24 sps:$4 sm:$0xff]  }
  0xe9   :  { %1940 = vmatprep.subr.bf16.mxu0 %v3717_v41  ;;  %v3814_v41 = vld [vmem:[#allocation5 + $0x1f0] ss:$24 sps:$4 sm:$0xff]  }
  0xeb   :  { %2062 = vmatpush1.bf16.msra.mxu1 %v3754_v50  ;;  %v3831_v50 = vld [vmem:[#allocation5 + $0x2e4] ss:$24 sps:$4 sm:$0xff]  }
  0xec   :  { %1941 = vmatpush1.bf16.msra.mxu0 %v3715_v42  ;;  %2063 = vmatprep.subr.bf16.mxu1 %v3762_v53  ;;  %v3819_v42 = vld [vmem:[#allocation5 + $0x224] ss:$24 sps:$4 sm:$0xff]   ;;  %v3832_v53 = vld [vmem:[#allocation5 + $0x310] ss:$24 sps:$4 sm:$0xff]  }
  0xed   :  { %1942 = vmatprep.subr.bf16.mxu0 %v3723_v45  ;;  %v3820_v45 = vld [vmem:[#allocation5 + $0x250] ss:$24 sps:$4 sm:$0xff]  }
  0xef   :  { %2064 = vmatpush1.bf16.msra.mxu1 %v3760_v54  ;;  %v3837_v54 = vld [vmem:[#allocation5 + $0x344] ss:$24 sps:$4 sm:$0xff]  }
  0xf0   :  { %1943 = vmatpush1.bf16.msra.mxu0 %v3721_v46  ;;  %2065 = vmatprep.subr.bf16.mxu1 %v3768_v57  ;;  %v3825_v46 = vld [vmem:[#allocation5 + $0x284] ss:$24 sps:$4 sm:$0xff]   ;;  %v3930_v57 = vld [vmem:[#allocation7 + $0x48] sm:$0xff]  }
  0xf1   :  { %1944 = vmatprep.subr.bf16.mxu0 %v3729_v49  ;;  %v3826_v49 = vld [vmem:[#allocation5 + $0x2b0] ss:$24 sps:$4 sm:$0xff]  }
  0xf3   :  { %2066 = vmatpush1.bf16.msra.mxu1 %v3766_v58  ;;  %v3835_v58 = vld [vmem:[#allocation5 + $0x340] ss:$24 sps:$4 sm:$0xff]  }
  0xf4   :  { %1945 = vmatpush1.bf16.msra.mxu0 %v3727_v51  ;;  %2067 = vmatprep.subr.bf16.mxu1 %v3774_v61  ;;  %v3829_v51 = vld [vmem:[#allocation5 + $0x2e0] ss:$24 sps:$4 sm:$0xff]   ;;  %v3932_v61 = vld [vmem:[#allocation7 + $0x50] sm:$0xff]  }
  0xf5   :  { %1946 = vmatprep.subr.bf16.mxu0 %v3735_v52  ;;  %v3834_v52 = vld [vmem:[#allocation5 + $0x314] ss:$24 sps:$4 sm:$0xff]  }
  0xf7   :  { %2068 = vmatpush1.bf16.msra.mxu1 %v3772_v62  ;;  %v3838_v62 = vld [vmem:[#allocation5 + $0x370] ss:$24 sps:$4 sm:$0xff]  }
  0xf8   :  { %1947 = vmatpush1.bf16.msra.mxu0 %v3733_v55  ;;  %2069 = vmatprep.subr.bf16.mxu1 %v3780_v2  ;;  %v3928_v55 = vld [vmem:[#allocation7 + $0x40] sm:$0xff]  }
  0xf9   :  { %1948 = vmatprep.subr.bf16.mxu0 %v3741_v56  ;;  %v3929_v56 = vld [vmem:[#allocation7] sm:$0xff]  }
  0xfa   :  { %v3841_v2 = vld [vmem:[#allocation5 + $0x3a0] ss:$24 sps:$4 sm:$0xff]  }
  0xfb   :  { %2070 = vmatpush1.bf16.msra.mxu1 %v3778_v3  ;;  %v3846_v3 = vld [vmem:[#allocation5 + $0x3d4] ss:$24 sps:$4 sm:$0xff]  }
  0xfc   :  { %1949 = vmatpush1.bf16.msra.mxu0 %v3739_v59  ;;  %2071 = vmatprep.subr.bf16.mxu1 %v3786_v6  ;;  %v3840_v59 = vld [vmem:[#allocation5 + $0x374] ss:$24 sps:$4 sm:$0xff]   ;;  %v3847_v6 = vld [vmem:[#allocation5 + $0x400] ss:$24 sps:$4 sm:$0xff]  }
  0xfd   :  { %1950 = vmatprep.subr.bf16.mxu0 %v3747_v60  ;;  %v3931_v60 = vld [vmem:[#allocation7 + $0x8] sm:$0xff]  }
  0xff   :  { %2072 = vmatpush1.bf16.msra.mxu1 %v3784_v8  ;;  %v3852_v8 = vld [vmem:[#allocation5 + $0x434] ss:$24 sps:$4 sm:$0xff]  }
 0x100   :  { %1951 = vmatpush1.bf16.msra.mxu0 %v3745_v63  ;;  %2073 = vmatprep.subr.bf16.mxu1 %v3792_v13  ;;  %v3843_v63 = vld [vmem:[#allocation5 + $0x3a4] ss:$24 sps:$4 sm:$0xff]  }
 0x101   :  { %1952 = vmatprep.subr.bf16.mxu0 %v3753_v1  ;;  %v3934_v1 = vld [vmem:[#allocation7 + $0x58] sm:$0xff]  }
 0x102   :  { %v3855_v13 = vld [vmem:[#allocation5 + $0x464] ss:$24 sps:$4 sm:$0xff]  }
 0x103   :  { %2074 = vmatpush1.bf16.msra.mxu1 %v3790_v14  ;;  %v3938_v14 = vld [vmem:[#allocation7 + $0x68] sm:$0xff]  }
 0x104   :  { %1953 = vmatpush1.bf16.msra.mxu0 %v3751_v4  ;;  %2075 = vmatprep.subr.bf16.mxu1 %v3798_v19  ;;  %v3844_v4 = vld [vmem:[#allocation5 + $0x3d0] ss:$24 sps:$4 sm:$0xff]   ;;  %v3858_v19 = vld [vmem:[#allocation5 + $0x494] ss:$24 sps:$4 sm:$0xff]  }
 0x105   :  { %1954 = vmatprep.subr.bf16.mxu0 %v3759_v5  ;;  %v3849_v5 = vld [vmem:[#allocation5 + $0x404] ss:$24 sps:$4 sm:$0xff]  }
 0x107   :  { %2076 = vmatpush1.bf16.msra.mxu1 %v3796_v20  ;;  %v3940_v20 = vld [vmem:[#allocation7 + $0x70] sm:$0xff]  }
 0x108   :  { %1955 = vmatpush1.bf16.msra.mxu0 %v3757_v9  ;;  %2077 = vmatprep.subr.bf16.mxu1 %v3804_v23  ;;  %v3936_v9 = vld [vmem:[#allocation7 + $0x60] sm:$0xff]  }
 0x109   :  { %2088 = vmatprep.subr.bf16.mxu0 %v3765_v12  ;;  %v3850_v12 = vld [vmem:[#allocation5 + $0x430] ss:$24 sps:$4 sm:$0xff]   ;;  %v3861_v23 = vld [vmem:[#allocation5 + $0x4c4] ss:$24 sps:$4 sm:$0xff]  }
 0x10b   :  { %1957 = vmatmul.mubr.bf16.vlgmr.msra.gmra.mrb[0].mxu0 %v4226_v16  ;;  %2078 = vmatpush1.bf16.msra.mxu1 %v3802_v24  ;;  %v3942_v24 = vld [vmem:[#allocation7 + $0x78] sm:$0xff]  }
 0x10c   :  { %2089 = vmatpush1.bf16.msra.mxu0 %v3763_v15  ;;  %2120 = vmatprep.mubr.bf16.mxu0 %v4206_v35  ;;  %v3801_v35 = vld [vmem:[#allocation5 + $0x134] ss:$24 sps:$4 sm:$0xff]  }
 0x10d   :  { %2090 = vmatprep.subr.bf16.mxu0 %v3771_v18  ;;  %3331 = vmatprep.subr.bf16.mxu1 %v3928_v55  ;;  %v3939_v15 = vld [vmem:[#allocation7 + $0x28] sm:$0xff]   ;;  %v3853_v18 = vld [vmem:[#allocation5 + $0x460] ss:$24 sps:$4 sm:$0xff]  }
 0x10e   :  { %2080 = vmatmul.mubr.bf16.vlgmr.msra.gmra.mrb[0].mxu1 %v4226_v16  ;;  %v3904_v55 = vld [vmem:[#allocation5 + $0x790] ss:$24 sps:$4 sm:$0xff]  }
 0x10f   :  { %3332 = vmatpush3.bf16.msra.mxu1 %v3929_v56  ;;  %v3909_v56 = vld [vmem:[#allocation5 + $0x7c4] ss:$24 sps:$4 sm:$0xff]  }
 0x110   :  { %2091 = vmatpush1.bf16.msra.mxu0 %v3769_v21  ;;  %3333 = vmatprep.subr.bf16.mxu1 %v3930_v57  ;;  %v3941_v21 = vld [vmem:[#allocation7 + $0x30] sm:$0xff]   ;;  %v3907_v57 = vld [vmem:[#allocation5 + $0x7c0] ss:$24 sps:$4 sm:$0xff]  }
 0x111   :  { %2092 = vmatprep.subr.bf16.mxu0 %v3777_v22  ;;  %v3856_v22 = vld [vmem:[#allocation5 + $0x490] ss:$24 sps:$4 sm:$0xff]  }
 0x113   :  { %3334 = vmatpush3.bf16.msra.mxu1 %v3931_v60  ;;  %v3915_v60 = vld [vmem:[#allocation5 + $0x824] ss:$24 sps:$4 sm:$0xff]  }
 0x114   :  { %2093 = vmatpush1.bf16.msra.mxu0 %v3775_v25  ;;  %3335 = vmatprep.subr.bf16.mxu1 %v3932_v61  ;;  %v3943_v25 = vld [vmem:[#allocation7 + $0x38] sm:$0xff]  }
 0x115   :  { %2094 = vmatprep.subr.bf16.mxu0 %v3783_v26  ;;  %v3859_v26 = vld [vmem:[#allocation5 + $0x4c0] ss:$24 sps:$4 sm:$0xff]  }
 0x116   :  { %v3913_v61 = vld [vmem:[#allocation5 + $0x820] ss:$24 sps:$4 sm:$0xff]  }
 0x118   :  { %2095 = vmatpush1.bf16.msra.mxu0 %v3781_v27  ;;  %v3864_v27 = vld [vmem:[#allocation5 + $0x4f4] ss:$24 sps:$4 sm:$0xff]  }
 0x119   :  { %2096 = vmatprep.subr.bf16.mxu0 %v3789_v28  ;;  %v3944_v28 = vld [vmem:[#allocation7 + $0xc0] sm:$0xff]  }
 0x11c   :  { %2097 = vmatpush1.bf16.msra.mxu0 %v3787_v29  ;;  %v3862_v29 = vld [vmem:[#allocation5 + $0x4f0] ss:$24 sps:$4 sm:$0xff]  }
 0x11d   :  { %2098 = vmatprep.subr.bf16.mxu0 %v3795_v30  ;;  %v3867_v30 = vld [vmem:[#allocation5 + $0x524] ss:$24 sps:$4 sm:$0xff]  }
 0x120   :  { %2099 = vmatpush1.bf16.msra.mxu0 %v3793_v31  ;;  %v3865_v31 = vld [vmem:[#allocation5 + $0x520] ss:$24 sps:$4 sm:$0xff]  }
 0x121   :  { %2100 = vmatprep.subr.bf16.mxu0 %v3801_v35  ;;  %v3870_v35 = vld [vmem:[#allocation5 + $0x554] ss:$24 sps:$4 sm:$0xff]  }
 0x124   :  { %2101 = vmatpush1.bf16.msra.mxu0 %v3799_v32  ;;  %v3868_v32 = vld [vmem:[#allocation5 + $0x550] ss:$24 sps:$4 sm:$0xff]  }
 0x125   :  { %2102 = vmatprep.subr.bf16.mxu0 %v3807_v33  ;;  %v3873_v33 = vld [vmem:[#allocation5 + $0x584] ss:$24 sps:$4 sm:$0xff]  }
 0x128   :  { %2103 = vmatpush1.bf16.msra.mxu0 %v3805_v34  ;;  %v3871_v34 = vld [vmem:[#allocation5 + $0x580] ss:$24 sps:$4 sm:$0xff]  }
 0x129   :  { %2104 = vmatprep.subr.bf16.mxu0 %v3810_v36  ;;  %v3876_v36 = vld [vmem:[#allocation5 + $0x5b4] ss:$24 sps:$4 sm:$0xff]  }
 0x12c   :  { %2105 = vmatpush1.bf16.msra.mxu0 %v3808_v37  ;;  %v3874_v37 = vld [vmem:[#allocation5 + $0x5b0] ss:$24 sps:$4 sm:$0xff]  }
 0x12d   :  { %2106 = vmatprep.subr.bf16.mxu0 %v3813_v38  ;;  %v3879_v38 = vld [vmem:[#allocation5 + $0x5e4] ss:$24 sps:$4 sm:$0xff]  }
 0x130   :  { %2107 = vmatpush1.bf16.msra.mxu0 %v3811_v39  ;;  %v3877_v39 = vld [vmem:[#allocation5 + $0x5e0] ss:$24 sps:$4 sm:$0xff]  }
 0x131   :  { %2108 = vmatprep.subr.bf16.mxu0 %v3816_v40  ;;  %v3882_v40 = vld [vmem:[#allocation5 + $0x614] ss:$24 sps:$4 sm:$0xff]  }
 0x134   :  { %2109 = vmatpush1.bf16.msra.mxu0 %v3814_v41  ;;  %v3880_v41 = vld [vmem:[#allocation5 + $0x610] ss:$24 sps:$4 sm:$0xff]  }
 0x135   :  { %2110 = vmatprep.subr.bf16.mxu0 %v3819_v42  ;;  %v3885_v42 = vld [vmem:[#allocation5 + $0x644] ss:$24 sps:$4 sm:$0xff]  }
 0x138   :  { %2111 = vmatpush1.bf16.msra.mxu0 %v3817_v43  ;;  %v3883_v43 = vld [vmem:[#allocation5 + $0x640] ss:$24 sps:$4 sm:$0xff]  }
 0x139   :  { %2112 = vmatprep.subr.bf16.mxu0 %v3822_v44  ;;  %v3888_v44 = vld [vmem:[#allocation5 + $0x674] ss:$24 sps:$4 sm:$0xff]  }
 0x13c   :  { %2113 = vmatpush1.bf16.msra.mxu0 %v3820_v45  ;;  %v3886_v45 = vld [vmem:[#allocation5 + $0x670] ss:$24 sps:$4 sm:$0xff]  }
 0x13d   :  { %2114 = vmatprep.subr.bf16.mxu0 %v3825_v46  ;;  %v3891_v46 = vld [vmem:[#allocation5 + $0x6a4] ss:$24 sps:$4 sm:$0xff]  }
 0x140   :  { %2115 = vmatpush1.bf16.msra.mxu0 %v3823_v47  ;;  %v3889_v47 = vld [vmem:[#allocation5 + $0x6a0] ss:$24 sps:$4 sm:$0xff]  }
 0x141   :  { %2116 = vmatprep.subr.bf16.mxu0 %v3828_v48  ;;  %v3894_v48 = vld [vmem:[#allocation5 + $0x6d4] ss:$24 sps:$4 sm:$0xff]  }
 0x144   :  { %2117 = vmatpush1.bf16.msra.mxu0 %v3826_v49  ;;  %v3892_v49 = vld [vmem:[#allocation5 + $0x6d0] ss:$24 sps:$4 sm:$0xff]  }
 0x145   :  { %2118 = vmatprep.subr.bf16.mxu0 %v3831_v50  ;;  %v3897_v50 = vld [vmem:[#allocation5 + $0x704] ss:$24 sps:$4 sm:$0xff]  }
 0x148   :  { %2119 = vmatpush1.bf16.msra.mxu0 %v3829_v51  ;;  %v3900_v51 = vld [vmem:[#allocation5 + $0x734] ss:$24 sps:$4 sm:$0xff]  }
 0x149   :  { %2129 = vmatprep.subr.bf16.mxu0 %v3834_v52  ;;  %v3903_v52 = vld [vmem:[#allocation5 + $0x764] ss:$24 sps:$4 sm:$0xff]  }
 0x14b   :  { %2121 = vmatmul.mubr.bf16.vlgmr.msra.gmra.mrb[4].mxu0 %v4210_v0  ;;  %v3933_v0 = vld [vmem:[#allocation7 + $0x10] sm:$0xff]  }
 0x14c   :  { %2130 = vmatpush1.bf16.msra.mxu0 %v3832_v53  ;;  %2161 = vmatprep.mubr.bf16.mxu0 %v4214_v17  ;;  %v3935_v17 = vld [vmem:[#allocation7 + $0x18] sm:$0xff]  }
 0x14d   :  { %2131 = vmatprep.subr.bf16.mxu0 %v3837_v54  ;;  %3336 = vmatpush3.bf16.msra.mxu1 %v3933_v0  ;;  %v3901_v53 = vld [vmem:[#allocation5 + $0x760] ss:$24 sps:$4 sm:$0xff]   ;;  %v3906_v54 = vld [vmem:[#allocation5 + $0x794] ss:$24 sps:$4 sm:$0xff]   ;;  %v3921_v0 = vld [vmem:[#allocation5 + $0x884] ss:$24 sps:$4 sm:$0xff]  }
 0x14e   :  { %3337 = vmatprep.subr.bf16.mxu1 %v3934_v1  ;;  %v3919_v1 = vld [vmem:[#allocation5 + $0x880] ss:$24 sps:$4 sm:$0xff]  }
 0x150   :  { %2132 = vmatpush1.bf16.msra.mxu0 %v3835_v58  ;;  %v3912_v58 = vld [vmem:[#allocation5 + $0x7f4] ss:$24 sps:$4 sm:$0xff]  }
 0x151   :  { %2133 = vmatprep.subr.bf16.mxu0 %v3840_v59  ;;  %3338 = vmatpush3.bf16.msra.mxu1 %v3935_v17  ;;  %v3910_v59 = vld [vmem:[#allocation5 + $0x7f0] ss:$24 sps:$4 sm:$0xff]   ;;  %v3927_v17 = vld [vmem:[#allocation5 + $0x8e4] ss:$24 sps:$4 sm:$0xff]  }
 0x152   :  { %3339 = vmatprep.subr.bf16.mxu1 %v3936_v9  ;;  %v4239_v9 = vld [vmem:[#allocation8] ss:$4 sm:$0x3f] }
 0x154   :  { %2134 = vmatpush1.bf16.msra.mxu0 %v3838_v62  ;;  %v3918_v62 = vld [vmem:[#allocation5 + $0x854] ss:$24 sps:$4 sm:$0xff]  }
 0x155   :  { %2135 = vmatprep.subr.bf16.mxu0 %v3843_v63  ;;  %3340 = vmatpush3.bf16.msra.mxu1 %v3937_v10  ;;  %v3916_v63 = vld [vmem:[#allocation5 + $0x850] ss:$24 sps:$4 sm:$0xff]  }
 0x156   :  { %3341 = vmatprep.subr.bf16.mxu1 %v3938_v14 }
 0x158   :  { %2136 = vmatpush1.bf16.msra.mxu0 %v3841_v2  ;;  %v3924_v2 = vld [vmem:[#allocation5 + $0x8b4] ss:$24 sps:$4 sm:$0xff]  }
 0x159   :  { %2137 = vmatprep.subr.bf16.mxu0 %v3846_v3  ;;  %3342 = vmatpush3.bf16.msra.mxu1 %v3939_v15  ;;  %v3922_v3 = vld [vmem:[#allocation5 + $0x8b0] ss:$24 sps:$4 sm:$0xff]  }
 0x15a   :  { %3343 = vmatprep.subr.bf16.mxu1 %v3940_v20 }
 0x15c   :  { %2138 = vmatpush1.bf16.msra.mxu0 %v3844_v4  ;;  %v3925_v4 = vld [vmem:[#allocation5 + $0x8e0] ss:$24 sps:$4 sm:$0xff]  }
 0x15d   :  { %2139 = vmatprep.subr.bf16.mxu0 %v3849_v5  ;;  %3344 = vmatpush3.bf16.msra.mxu1 %v3941_v21  ;;  %v372_v5 = vlaneseq }
 0x15e   :  { %3345 = vmatprep.subr.bf16.mxu1 %v3942_v24 }
 0x160   :  { %2140 = vmatpush1.bf16.msra.mxu0 %v3847_v6  ;;  %v4236_v6 = vshrl.u32 %v372_v5, 7 }
 0x161   :  { %2141 = vmatprep.subr.bf16.mxu0 %v3852_v8  ;;  %3346 = vmatpush3.bf16.msra.mxu1 %v3943_v25 }
 0x162   :  { %3353 = vmatprep.subr.bf16.mxu1 %v3944_v28  ;;  %v374_v8 = vsub.s32 0, %v4236_v6  ;;  %v378_v10 = vsub.s32 1, %v4236_v6  ;;  %v386_v21 = vsub.s32 3, %v4236_v6  ;;  %v394_v5 = vsub.s32 5, %v4236_v6 }
 0x164   :  { %2142 = vmatpush1.bf16.msra.mxu0 %v3850_v12  ;;  %v375_v12 = vrot.slane %v4239_v9, %v374_v8 }
 0x165   :  { %2143 = vmatprep.subr.bf16.mxu0 %v3855_v13  ;;  %v379_v13 = vrot.slane %v4239_v9, %v378_v10  ;;  %v395_v10 = vrot.slane %v4239_v9, %v394_v5 }
 0x168   :  { %2144 = vmatpush1.bf16.msra.mxu0 %v3853_v18 }
 0x169   :  { %2145 = vmatprep.subr.bf16.mxu0 %v3858_v19 }
 0x16c   :  { %2146 = vmatpush1.bf16.msra.mxu0 %v3856_v22  ;;  %v387_v22 = vrot.slane %v4239_v9, %v386_v21 }
 0x16d   :  { %2147 = vmatprep.subr.bf16.mxu0 %v3861_v23 }
 0x170   :  { %2148 = vmatpush1.bf16.msra.mxu0 %v3859_v26 }
 0x171   :  { %2149 = vmatprep.subr.bf16.mxu0 %v3864_v27 }
 0x174   :  { %2150 = vmatpush1.bf16.msra.mxu0 %v3862_v29 }
 0x175   :  { %2151 = vmatprep.subr.bf16.mxu0 %v3867_v30 }
 0x178   :  { %2152 = vmatpush1.bf16.msra.mxu0 %v3865_v31  ;;  %v3945_v31 = vld [vmem:[#allocation7 + $0x80] sm:$0xff]  }
 0x179   :  { %2153 = vmatprep.subr.bf16.mxu0 %v3870_v35 }
 0x17c   :  { %2154 = vmatpush1.bf16.msra.mxu0 %v3868_v32  ;;  %v3946_v32 = vld [vmem:[#allocation7 + $0xc8] sm:$0xff]  }
 0x17d   :  { %2155 = vmatprep.subr.bf16.mxu0 %v3873_v33  ;;  %v3947_v33 = vld [vmem:[#allocation7 + $0x88] sm:$0xff]  }
 0x180   :  { %2156 = vmatpush1.bf16.msra.mxu0 %v3871_v34  ;;  %v3948_v34 = vld [vmem:[#allocation7 + $0xd0] sm:$0xff]  }
 0x181   :  { %2157 = vmatprep.subr.bf16.mxu0 %v3876_v36  ;;  %v382_v36 = vsub.s32 2, %v4236_v6 }
 0x184   :  { %2158 = vmatpush1.bf16.msra.mxu0 %v3874_v37  ;;  %v3949_v37 = vld [vmem:[#allocation7 + $0x90] sm:$0xff]  }
 0x185   :  { %2159 = vmatprep.subr.bf16.mxu0 %v3879_v38  ;;  %v3950_v38 = vld [vmem:[#allocation7 + $0xd8] sm:$0xff]  }
 0x188   :  { %2160 = vmatpush1.bf16.msra.mxu0 %v3877_v39 }
 0x189   :  { %2170 = vmatprep.subr.bf16.mxu0 %v3882_v40  ;;  %v383_v40 = vrot.slane %v4239_v9, %v382_v36 }
 0x18b   :  { %2162 = vmatmul.mubr.bf16.vlgmr.msra.gmra.mrb[4].mxu0 %v4218_v7  ;;  %v3895_v7 = vld [vmem:[#allocation5 + $0x700] ss:$24 sps:$4 sm:$0xff]  }
 0x18c   :  { %2171 = vmatpush1.bf16.msra.mxu0 %v3880_v41  ;;  %2202 = vmatprep.mubr.bf16.mxu0 %v4220_v11  ;;  %v3898_v11 = vld [vmem:[#allocation5 + $0x730] ss:$24 sps:$4 sm:$0xff]  }
 0x18d   :  { %2172 = vmatprep.subr.bf16.mxu0 %v3885_v42  ;;  %v3951_v42 = vld [vmem:[#allocation7 + $0x98] sm:$0xff]  }
 0x190   :  { %2173 = vmatpush1.bf16.msra.mxu0 %v3883_v43  ;;  %v3952_v43 = vld [vmem:[#allocation7 + $0xe0] sm:$0xff]  }
 0x191   :  { %2174 = vmatprep.subr.bf16.mxu0 %v3888_v44 }
 0x194   :  { %2175 = vmatpush1.bf16.msra.mxu0 %v3886_v45  ;;  %v3953_v45 = vld [vmem:[#allocation7 + $0xa0] sm:$0xff]  }
 0x195   :  { %2176 = vmatprep.subr.bf16.mxu0 %v3891_v46  ;;  %v3954_v46 = vld [vmem:[#allocation7 + $0xe8] sm:$0xff]  }
 0x198   :  { %2177 = vmatpush1.bf16.msra.mxu0 %v3889_v47  ;;  %v3955_v47 = vld [vmem:[#allocation7 + $0xa8] sm:$0xff]  }
 0x199   :  { %2178 = vmatprep.subr.bf16.mxu0 %v3894_v48  ;;  %v3956_v48 = vld [vmem:[#allocation7 + $0xf0] sm:$0xff]  }
 0x19c   :  { %2179 = vmatpush1.bf16.msra.mxu0 %v3892_v49  ;;  %v3957_v49 = vld [vmem:[#allocation7 + $0xb0] sm:$0xff]  }
 0x19d   :  { %2180 = vmatprep.subr.bf16.mxu0 %v3897_v50  ;;  %v3958_v50 = vld [vmem:[#allocation7 + $0xf8] sm:$0xff]  }
 0x1a0   :  { %2181 = vmatpush1.bf16.msra.mxu0 %v3895_v7 }
 0x1a1   :  { %2182 = vmatprep.subr.bf16.mxu0 %v3900_v51  ;;  %v3959_v51 = vld [vmem:[#allocation7 + $0xb8] sm:$0xff]  }
 0x1a4   :  { %2183 = vmatpush1.bf16.msra.mxu0 %v3898_v11  ;;  %v3960_v11 = vld [vmem:[#allocation7 + $0x140] sm:$0xff]  }
 0x1a5   :  { %2184 = vmatprep.subr.bf16.mxu0 %v3903_v52 }
 0x1a8   :  { %2185 = vmatpush1.bf16.msra.mxu0 %v3901_v53  ;;  %v3961_v53 = vld [vmem:[#allocation7 + $0x100] sm:$0xff]  }
 0x1a9   :  { %2186 = vmatprep.subr.bf16.mxu0 %v3906_v54  ;;  %v3962_v54 = vld [vmem:[#allocation7 + $0x148] sm:$0xff]  }
 0x1ac   :  { %2187 = vmatpush1.bf16.msra.mxu0 %v3904_v55  ;;  %v3963_v55 = vld [vmem:[#allocation7 + $0x108] sm:$0xff]  }
 0x1ad   :  { %2188 = vmatprep.subr.bf16.mxu0 %v3909_v56  ;;  %v3964_v56 = vld [vmem:[#allocation7 + $0x150] sm:$0xff]  }
 0x1b0   :  { %2189 = vmatpush1.bf16.msra.mxu0 %v3907_v57  ;;  %v3965_v57 = vld [vmem:[#allocation7 + $0x110] sm:$0xff]  }
 0x1b1   :  { %2190 = vmatprep.subr.bf16.mxu0 %v3912_v58  ;;  %v3966_v58 = vld [vmem:[#allocation7 + $0x158] sm:$0xff]  }
 0x1b4   :  { %2191 = vmatpush1.bf16.msra.mxu0 %v3910_v59  ;;  %v3967_v59 = vld [vmem:[#allocation7 + $0x118] sm:$0xff]  }
 0x1b5   :  { %2192 = vmatprep.subr.bf16.mxu0 %v3915_v60  ;;  %v3968_v60 = vld [vmem:[#allocation7 + $0x160] sm:$0xff]  }
 0x1b8   :  { %2193 = vmatpush1.bf16.msra.mxu0 %v3913_v61  ;;  %v3969_v61 = vld [vmem:[#allocation7 + $0x120] sm:$0xff]  }
 0x1b9   :  { %2194 = vmatprep.subr.bf16.mxu0 %v3918_v62  ;;  %v3970_v62 = vld [vmem:[#allocation7 + $0x168] sm:$0xff]  }
 0x1bc   :  { %2195 = vmatpush1.bf16.msra.mxu0 %v3916_v63  ;;  %v3971_v63 = vld [vmem:[#allocation7 + $0x128] sm:$0xff]  }
 0x1bd   :  { %2196 = vmatprep.subr.bf16.mxu0 %v3921_v0  ;;  %v3972_v0 = vld [vmem:[#allocation7 + $0x170] sm:$0xff]  }
 0x1c0   :  { %2197 = vmatpush1.bf16.msra.mxu0 %v3919_v1  ;;  %v3973_v1 = vld [vmem:[#allocation7 + $0x130] sm:$0xff]  }
 0x1c1   :  { %2198 = vmatprep.subr.bf16.mxu0 %v3924_v2  ;;  %v3974_v2 = vld [vmem:[#allocation7 + $0x178] sm:$0xff]  }
 0x1c4   :  { %2199 = vmatpush1.bf16.msra.mxu0 %v3922_v3  ;;  %v3975_v3 = vld [vmem:[#allocation7 + $0x138] sm:$0xff]  }
 0x1c5   :  { %2200 = vmatprep.subr.bf16.mxu0 %v3927_v17  ;;  %v4130_v17 = vmov 0.0  }
 0x1c8   :  { %2201 = vmatpush1.bf16.msra.mxu0 %v3925_v4  ;;  %v390_v4 = vsub.s32 4, %v4236_v6  ;;  %v3977_v6 = vld [vmem:[#allocation7 + $0x188] sm:$0xff]  }
 0x1ca   :  { %v391_v8 = vrot.slane %v4239_v9, %v390_v4  ;;  %v3978_v9 = vld [vmem:[#allocation7 + $0x190] sm:$0xff]  }
 0x1cb   :  { %2203 = vmatmul.mubr.bf16.vlgmr.msra.gmra.mrb[4].mxu0 %v4226_v16 }
 0x1de   :  { %v1958_v14 = vpop.f32.mrb[0].mxu0 }
 0x1df   :  { %v3455_v15 = vadd.f32 %v1958_v14, %v375_v12  ;;  %v1960_v18 = vpop.f32.mrb[1].mxu0 }
 0x1e0   :  { %v3456_v19 = vadd.f32 %v1960_v18, %v379_v13  ;;  %v1962_v20 = vpop.f32.mrb[2].mxu0 }
 0x1e1   :  { %3992 = vtanh.f32 %v3455_v15  ;;  %v1963_v16 = vpop.f32.mrb[3].mxu0  ;;  %v2081_v23 = vpop.f32.mrb[0].mxu1 }
 0x1e2   :  { %3994 = vtanh.f32 %v3456_v19  ;;  %v2083_v24 = vpop.f32.mrb[1].mxu1  ;;  %v3457_v44 = vadd.f32 %v2081_v23, %v383_v40  ;;  %v3982_v40 = vld [vmem:[#allocation7 + $0x1b0] sm:$0xff]  }
 0x1e3   :  { %v3458_v26 = vadd.f32 %v2083_v24, %v387_v22  ;;  %v2085_v27 = vpop.f32.mrb[2].mxu1  ;;  %v3976_v22 = vld [vmem:[#allocation7 + $0x180] sm:$0xff]   ;;  %v3979_v24 = vld [vmem:[#allocation7 + $0x198] sm:$0xff]  }
 0x1e4   :  { %v2086_v29 = vpop.f32.mrb[3].mxu1 }
 0x1e5   :  { %3996 = vtanh.f32 %v3458_v26 }
 0x1e6   :  { %3998 = vtanh.f32 %v3457_v44 }
 0x1eb   :  { %v3993_v25 = vpop.eup %3992 }
 0x1ec   :  { %v3995_v28 = vpop.eup %3994  ;;  %v2313_v35 = vpack.c.bf16 %v3993_v25, %v3993_v25  ;;  %v3980_v25 = vld [vmem:[#allocation7 + $0x1a0] sm:$0xff]  }
 0x1ed   :  { %v2314_v30 = vpack.c.bf16 %v3995_v28, %v3995_v28 }
 0x1ef   :  { %2644 = vmatprep.mubr.bf16.mxu1 %v2314_v30  ;;  %v3997_v39 = vpop.eup %3996 }
 0x1f0   :  { %2645 = vmatmul.mubr.bf16.vlgmr.msra.gmra.mrb[4].mxu1 %v2313_v35  ;;  %v2316_v41 = vpack.c.bf16 %v3997_v39, %v3997_v39  ;;  %v3999_v7 = vpop.eup %3998  ;;  %v3981_v39 = vld [vmem:[#allocation7 + $0x1a8] sm:$0xff]  }
 0x1f1   :  { %3354 = vmatpush3.bf16.msra.mxu1 %v3945_v31  ;;  %v2315_v52 = vpack.c.bf16 %v3999_v7, %v3999_v7  ;;  %v3264_v31 = vld [vmem:[#allocation8 + $0x1] ss:$0 sm:$0xff] }
 0x1f2   :  { %3355 = vmatprep.subr.bf16.mxu1 %v3946_v32  ;;  %2684 = vmatprep.mubr.bf16.mxu1 %v2316_v41  ;;  %v3983_v41 = vld [vmem:[#allocation7 + $0x1b8] sm:$0xff]  }
 0x1f5   :  { %3356 = vmatpush3.bf16.msra.mxu1 %v3947_v33 }
 0x1f6   :  { %3357 = vmatprep.subr.bf16.mxu1 %v3948_v34 }
 0x1f9   :  { %3358 = vmatpush3.bf16.msra.mxu1 %v3949_v37 }
 0x1fa   :  { %3359 = vmatprep.subr.bf16.mxu1 %v3950_v38 }
 0x1fd   :  { %3360 = vmatpush3.bf16.msra.mxu1 %v3951_v42 }
 0x1fe   :  { %3361 = vmatprep.subr.bf16.mxu1 %v3952_v43 }
 0x201   :  { %3362 = vmatpush3.bf16.msra.mxu1 %v3953_v45 }
 0x202   :  { %3363 = vmatprep.subr.bf16.mxu1 %v3954_v46 }
 0x205   :  { %3364 = vmatpush3.bf16.msra.mxu1 %v3955_v47 }
 0x206   :  { %3365 = vmatprep.subr.bf16.mxu1 %v3956_v48 }
 0x209   :  { %3366 = vmatpush3.bf16.msra.mxu1 %v3957_v49 }
 0x20a   :  { %3367 = vmatprep.subr.bf16.mxu1 %v3958_v50  ;;  %v3984_v50 = vld [vmem:[#allocation7 + $0x1c0] sm:$0xff]  }
 0x20d   :  { %3368 = vmatpush3.bf16.msra.mxu1 %v3959_v51  ;;  %v3985_v51 = vld [vmem:[#allocation7 + $0x1c8] sm:$0xff]  }
 0x20e   :  { %3375 = vmatprep.subr.bf16.mxu1 %v3960_v11  ;;  %v3986_v11 = vld [vmem:[#allocation7 + $0x1d0] sm:$0xff]  }
 0x210   :  { %2685 = vmatmul.mubr.bf16.vlgmr.msra.gmra.mrb[8].mxu1 %v2315_v52  ;;  %v3987_v52 = vld [vmem:[#allocation7 + $0x1d8] sm:$0xff]  }
 0x211   :  { %3376 = vmatpush3.bf16.msra.mxu1 %v3961_v53  ;;  %v3988_v53 = vld [vmem:[#allocation7 + $0x1e0] sm:$0xff]  }
 0x212   :  { %3377 = vmatprep.subr.bf16.mxu1 %v3962_v54  ;;  %v3989_v54 = vld [vmem:[#allocation7 + $0x1e8] sm:$0xff]  }
 0x215   :  { %3378 = vmatpush3.bf16.msra.mxu1 %v3963_v55  ;;  %v3990_v55 = vld [vmem:[#allocation7 + $0x1f0] sm:$0xff]  }
 0x216   :  { %3379 = vmatprep.subr.bf16.mxu1 %v3964_v56  ;;  %v3991_v56 = vld [vmem:[#allocation7 + $0x1f8] sm:$0xff]  }
 0x219   :  { %3380 = vmatpush3.bf16.msra.mxu1 %v3965_v57  ;;  %v3313_v57 = vld [vmem:[#allocation8 + $0x2] ss:$0 sm:$0xff] }
 0x21a   :  { %3381 = vmatprep.subr.bf16.mxu1 %v3966_v58 }
 0x21d   :  { %3382 = vmatpush3.bf16.msra.mxu1 %v3967_v59 }
 0x21e   :  { %3383 = vmatprep.subr.bf16.mxu1 %v3968_v60 }
 0x221   :  { %3384 = vmatpush3.bf16.msra.mxu1 %v3969_v61 }
 0x222   :  { %3385 = vmatprep.subr.bf16.mxu1 %v3970_v62 }
 0x225   :  { %3386 = vmatpush3.bf16.msra.mxu1 %v3971_v63 }
 0x226   :  { %3387 = vmatprep.subr.bf16.mxu1 %v3972_v0 }
 0x229   :  { %3388 = vmatpush3.bf16.msra.mxu1 %v3973_v1 }
 0x22a   :  { %3389 = vmatprep.subr.bf16.mxu1 %v3974_v2  ;;  %v3322_v2 = vld [vmem:[#allocation8 + $0x3] ss:$0 sm:$0xff] }
 0x22d   :  { %3390 = vmatpush3.bf16.msra.mxu1 %v3975_v3 }
 0x22e   :  { %3415 = vmatprep.subr.bf16.mxu1 %v4130_v17 }
 0x29e   :  { %v2204_v12 = vpop.f32.mrb[4].mxu0 }
 0x29f   :  { %v3459_v13 = vadd.f32 %v2204_v12, %v391_v8  ;;  %v2206_v14 = vpop.f32.mrb[5].mxu0 }
 0x2a0   :  { %v3460_v15 = vadd.f32 %v2206_v14, %v395_v10  ;;  %v2208_v18 = vpop.f32.mrb[6].mxu0 }
 0x2a1   :  { %4000 = vtanh.f32 %v3459_v13  ;;  %v2209_v19 = vpop.f32.mrb[7].mxu0 }
 0x2a2   :  { %4002 = vtanh.f32 %v3460_v15 }
 0x2ab   :  { %v4001_v20 = vpop.eup %4000 }
 0x2ac   :  { %v4003_v16 = vpop.eup %4002  ;;  %v2317_v23 = vpack.c.bf16 %v4001_v20, %v4001_v20 }
 0x2ad   :  { %v2318_v21 = vpack.c.bf16 %v4003_v16, %v4003_v16 }
 0x2af   :  { %2724 = vmatprep.mubr.bf16.mxu1 %v2318_v21 }
 0x2b0   :  { %2725 = vmatmul.mubr.bf16.vlgmr.msra.gmra.mrb[12].mxu1 %v2317_v23 }
 0x2b1   :  { %3416 = vmatpush3.bf16.msra.mxu1 %v3976_v22  ;;  %3431 = vmatprep.mubr.msk.bf16.mxu1 %vm4131_vm0, %v4130_v17 }
 0x2b2   :  { %3417 = vmatprep.subr.bf16.mxu1 %v4130_v17 }
 0x2b5   :  { %3418 = vmatpush3.bf16.msra.mxu1 %v3977_v6 }
 0x2b6   :  { %3419 = vmatprep.subr.bf16.mxu1 %v4130_v17 }
 0x2b9   :  { %3420 = vmatpush3.bf16.msra.mxu1 %v3978_v9 }
 0x2ba   :  { %3421 = vmatprep.subr.bf16.mxu1 %v4130_v17 }
 0x2bd   :  { %3422 = vmatpush3.bf16.msra.mxu1 %v3979_v24 }
 0x2be   :  { %3423 = vmatprep.subr.bf16.mxu1 %v4130_v17 }
 0x2c1   :  { %3424 = vmatpush3.bf16.msra.mxu1 %v3980_v25 }
 0x2c2   :  { %3425 = vmatprep.subr.bf16.mxu1 %v4130_v17 }
 0x2c3   :  { %v3347_v26 = vpop.f32.mrb[4].mxu1 }
 0x2c4   :  { %v3348_v27 = vpop.f32.mrb[5].mxu1 }
 0x2c5   :  { %v3349_v28 = vadd.f32 %v3348_v27, %v3347_v26  ;;  %v3350_v29 = vpop.f32.mrb[6].mxu1  ;;  %3426 = vmatpush3.bf16.msra.mxu1 %v3981_v39 }
 0x2c6   :  { %v3351_v30 = vpop.f32.mrb[7].mxu1  ;;  %3427 = vmatprep.subr.bf16.mxu1 %v4130_v17 }
 0x2c7   :  { %v2647_v33 = vadd.f32 %v3349_v28, %v3264_v31 }
 0x2c9   :  { %3428 = vmatpush3.bf16.msra.mxu1 %v3982_v40 }
 0x2ca   :  { %3429 = vmatprep.subr.bf16.mxu1 %v4130_v17 }
 0x2cd   :  { %3430 = vmatpush3.bf16.msra.mxu1 %v3983_v41 }
 0x2ce   :  { %3435 = vmatprep.subr.bf16.mxu1 %v4130_v17 }
 0x2e3   :  { %v3369_v35 = vpop.f32.mrb[8].mxu1 }
 0x2e4   :  { %v3370_v32 = vpop.f32.mrb[9].mxu1 }
 0x2e5   :  { %v3371_v34 = vadd.f32 %v3370_v32, %v3369_v35  ;;  %v3372_v36 = vpop.f32.mrb[10].mxu1 }
 0x2e6   :  { %v3373_v37 = vpop.f32.mrb[11].mxu1 }
 0x2e7   :  { %v2687_v38 = vadd.f32 %v3371_v34, %v2647_v33 }
 0x383   :  { %v3391_v42 = vpop.f32.mrb[12].mxu1 }
 0x384   :  { %v3392_v43 = vpop.f32.mrb[13].mxu1 }
 0x385   :  { %v3393_v44 = vadd.f32 %v3392_v43, %v3391_v42  ;;  %v3394_v45 = vpop.f32.mrb[14].mxu1 }
 0x386   :  { %v3395_v46 = vpop.f32.mrb[15].mxu1 }
 0x387   :  { %v2727_v47 = vadd.f32 %v3393_v44, %v2687_v38 }
 0x389   :  { %vm2732_vm1 = vcmp.gt.f32.partialorder %v2727_v47, 0.0  ;;  %v2733_v48 = vmul.f32 0.1, %v2727_v47 }
 0x38b   :  { %v2734_v49 = vsel %vm2732_vm1, %v2727_v47, %v2733_v48 }
 0x38c   :  { %v2751_v7 = vpack.c.bf16 %v2734_v49, %v2734_v49 }
 0x38e   :  { %3432 = vmatmul.mubr.bf16.vlgmr.msra.gmra.mrb[16].mxu1 %v2751_v7 }
 0x38f   :  { %3436 = vmatpush3.bf16.msra.mxu1 %v3984_v50  ;;  %3451 = vmatprep.mubr.msk.bf16.mxu1 %vm4131_vm0, %v4130_v17 }
 0x390   :  { %3437 = vmatprep.subr.bf16.mxu1 %v4130_v17 }
 0x393   :  { %3438 = vmatpush3.bf16.msra.mxu1 %v3985_v51 }
 0x394   :  { %3439 = vmatprep.subr.bf16.mxu1 %v4130_v17 }
 0x397   :  { %3440 = vmatpush3.bf16.msra.mxu1 %v3986_v11 }
 0x398   :  { %3441 = vmatprep.subr.bf16.mxu1 %v4130_v17 }
 0x39b   :  { %3442 = vmatpush3.bf16.msra.mxu1 %v3987_v52 }
 0x39c   :  { %3443 = vmatprep.subr.bf16.mxu1 %v4130_v17 }
 0x39f   :  { %3444 = vmatpush3.bf16.msra.mxu1 %v3988_v53 }
 0x3a0   :  { %3445 = vmatprep.subr.bf16.mxu1 %v4130_v17 }
 0x3a3   :  { %3446 = vmatpush3.bf16.msra.mxu1 %v3989_v54 }
 0x3a4   :  { %3447 = vmatprep.subr.bf16.mxu1 %v4130_v17 }
 0x3a7   :  { %3448 = vmatpush3.bf16.msra.mxu1 %v3990_v55 }
 0x3a8   :  { %3449 = vmatprep.subr.bf16.mxu1 %v4130_v17 }
 0x3ab   :  { %3450 = vmatpush3.bf16.msra.mxu1 %v3991_v56 }
 0x461   :  { %v2839_v58 = vpop.f32.mrb[16].mxu1 }
 0x462   :  { %v2840_v59 = vadd.f32 %v3313_v57, %v2839_v58  ;;  %v3433_v60 = vpop.f32.mrb[17].mxu1 }
 0x463   :  { %v2842_v61 = vpop.f32.mrb[18].mxu1 }
 0x464   :  { %vm2845_vm2 = vcmp.gt.f32.partialorder %v2840_v59, 0.0  ;;  %v2846_v62 = vmul.f32 0.1, %v2840_v59  ;;  %v3434_v63 = vpop.f32.mrb[19].mxu1 }
 0x466   :  { %v2847_v0 = vsel %vm2845_vm2, %v2840_v59, %v2846_v62 }
 0x467   :  { %v2864_v1 = vpack.c.bf16 %v2847_v0, %v2847_v0 }
 0x469   :  { %3452 = vmatmul.mubr.bf16.vlgmr.msra.gmra.mrb[20].mxu1 %v2864_v1 }
 0x53c   :  { %v2952_v3 = vpop.f32.mrb[20].mxu1 }
 0x53d   :  { %v2953_v4 = vadd.f32 %v3322_v2, %v2952_v3  ;;  %v3453_v5 = vpop.f32.mrb[21].mxu1 }
 0x53e   :  { %v2955_v17 = vpop.f32.mrb[22].mxu1 }
 0x53f   :  { %2958 = vst [vmem:[#allocation10] sm:$0xff] %v2953_v4  ;;  %v3454_v8 = vpop.f32.mrb[23].mxu1 }
 0x540   :  { %4103 = shalt.err (!%p4100_p8)
}
 0x541   :  { %s4104_s15 = scalar_lea.hbm %s4288_s4, 128 }
 0x542   :  { %p4105_p9 = scmp.ne.s32.totalorder %s4288_s4, %s4104_s15  ;;  %p4108_p10 = scmp.lt.u32.totalorder %s4104_s15, %s4288_s4 }
 0x544   :  { %p4110_p11 = pnand %p4108_p10, %p4105_p9 }
 0x546   :  { %4113 = shalt.err (!%p4110_p11)
}
 0x547   :  { %2968 = dma.vmem_to_hbm [thread:$0]  %s2966_s12, 128, %s4288_s4, [#allocation4]  }
 0x548   :  { %4120 = dma.done.wait [#allocation4], 128  }
 0x549   :  { %4121 = vsyncadd [#allocation4], 4294967168 }
 0x54a   :  { %2972 = vsyncpa [#allocation3], 1 }
 0x54b   :  { %2973 = vsyncpa [#allocation6], 1 }
 0x54c   :  { %2974 = vsyncpa [#allocation9], 1 }
 0x54d   :  { %2975 = vsyncpa [#allocation4], 1 }

</bundles_post_ra>
